<compile_context>
chip_gen: v6e
topology: v6e:2x2x1
jax: 0.10.0
libtpu: 0.0.40
codegen_flags: <defaults>
</compile_context>

<pallas_src>
import jax
import jax.numpy as jnp
from jax.experimental import pallas as pl
from jax.experimental.pallas import tpu as pltpu

INPUT_DIM = 32            # node feature dim = LSTM hidden dim
OUTPUT_DIM = 8            # number of classes
N_NODES = 16              # nodes per graph
NUM_GRAPHS = 32           # graphs processed in one call
GRAPHS_PER_TILE = 8       # graphs per grid step  -> 8*16 = 128 rows per matmul tile
TILE_ROWS = GRAPHS_PER_TILE * N_NODES
BN_EPS = 1e-5
NUM_LSTM_LAYERS = 3


def _sigmoid(v):
    # 1/(1+exp(-v)) with the divide replaced by the EUP approx reciprocal (separate VLIW slot).
    return pl.reciprocal(1.0 + jnp.exp(-v), approx=True)


def lstm_gcn_kernel(x_ref, a_ref, gcn_wt_ref, gcn_b_ref,
                    lstm_wt_ref, lstm_b_ref, bn2_ss_ref,
                    lin1_wt_ref, lin1_b_ref, lin2_wt_ref, lin2_b_ref,
                    out_ref):
    x = x_ref[...]                       # [TILE_ROWS, D]   (GRAPHS_PER_TILE graphs stacked)
    a = a_ref[0]                         # [TILE_ROWS, TILE_ROWS] block-diagonal A_hat

    # ---- GCNConv with bn1 folded in:  A_hat @ (X @ (W^T * s1)) + (b*s1 + t1), then ReLU ----
    h = jnp.dot(x, gcn_wt_ref[...], preferred_element_type=jnp.float32)       # [R, D]
    h = jnp.dot(a, h, preferred_element_type=jnp.float32)                     # [R, D]
    h = jnp.maximum(h + gcn_b_ref[...], 0.0)

    # ---- 3-layer LSTM, seq_len = 1, zero initial state ----
    # forget gate multiplies c_prev == 0 -> removed; gate matmul kept at full 4D=128 lanes.
    d = h.shape[1]
    b_all = lstm_b_ref[...]                                                   # [3, 4D]
    for layer in range(NUM_LSTM_LAYERS):
        gates = jnp.dot(h, lstm_wt_ref[layer],
                        preferred_element_type=jnp.float32) + b_all[layer:layer + 1, :]
        i_g = _sigmoid(gates[:, 0 * d:1 * d])
        g_g = jnp.tanh(gates[:, 2 * d:3 * d])
        o_g = _sigmoid(gates[:, 3 * d:4 * d])
        h = o_g * jnp.tanh(i_g * g_g)                                         # c = i*g (f*c_prev = 0)

    # ---- bn2 (eval) as precomputed scale/shift (cannot fold across the next ReLU), + ReLU ----
    bn2 = bn2_ss_ref[...]                                                     # rows: scale, shift
    h = jnp.maximum(h * bn2[0:1, :] + bn2[1:2, :], 0.0)

    # ---- MLP head: Linear -> ReLU -> Linear ----
    h = jnp.maximum(jnp.dot(h, lin1_wt_ref[...], preferred_element_type=jnp.float32)
                    + lin1_b_ref[...], 0.0)
    z = jnp.dot(h, lin2_wt_ref[...], preferred_element_type=jnp.float32) + lin2_b_ref[...]

    # (dropout: identity in eval mode)

    # ---- log_softmax over classes ----
    z = z - jnp.max(z, axis=1, keepdims=True)
    out_ref[...] = z - jnp.log(jnp.sum(jnp.exp(z), axis=1, keepdims=True))


def lstm_gcn_forward(x_flat, a_tiles, params):
    total_rows, d = x_flat.shape
    num_tiles, tile_rows, _ = a_tiles.shape
    out_dim = params["lin2_wt"].shape[1]

    def const_spec(arr):
        nd = arr.ndim
        # Constant block index -> the weight stays VMEM-resident across the whole grid.
        return pl.BlockSpec(arr.shape, lambda *_: (0,) * nd)

    weight_order = ["gcn_wt", "gcn_b", "lstm_wt", "lstm_b", "bn2_ss",
                    "lin1_wt", "lin1_b", "lin2_wt", "lin2_b"]
    weights = [params[k] for k in weight_order]

    in_specs = [
        pl.BlockSpec((tile_rows, d), lambda g: (g, 0)),                  # node-feature tile
        pl.BlockSpec((1, tile_rows, tile_rows), lambda g: (g, 0, 0)),    # block-diag adjacency tile
    ] + [const_spec(w) for w in weights]

    out_specs = pl.BlockSpec((tile_rows, out_dim), lambda g: (g, 0))     # contiguous row writes

    return pl.pallas_call(
        lstm_gcn_kernel,
        out_shape=jax.ShapeDtypeStruct((total_rows, out_dim), jnp.float32),
        grid=(num_tiles,),
        in_specs=in_specs,
        out_specs=out_specs,
        compiler_params=pltpu.CompilerParams(
            dimension_semantics=("parallel",),          # v7x: split tiles across both TCs
            vmem_limit_bytes=32 * 1024 * 1024),          # safe on v5e/v6e/v7x (64 MiB physical)
    )(x_flat, a_tiles, *weights)


def build_gcn_adjacency(edge_index, n):
    """Dense symmetric-normalized adjacency with self-loops (PyG gcn_norm)."""
    src, dst = edge_index[0], edge_index[1]
    adj = jnp.zeros((n, n), jnp.float32).at[dst, src].set(1.0)
    adj = adj + jnp.eye(n, dtype=jnp.float32)
    deg = adj.sum(axis=1)
    dinv = jax.lax.rsqrt(deg)
    return dinv[:, None] * adj * dinv[None, :]


def pack_inputs(x, a_hat, graphs_per_tile):
    """Flatten node features and pack per-graph A_hat into block-diagonal per-tile matrices."""
    g, n, d = x.shape
    assert g % graphs_per_tile == 0
    num_tiles = g // graphs_per_tile
    x_flat = x.reshape(g * n, d)
    a_g = a_hat.reshape(num_tiles, graphs_per_tile, n, n)
    eye = jnp.eye(graphs_per_tile, dtype=a_hat.dtype)
    a_tiles = jnp.einsum('gh,tgij->tgihj', eye, a_g).reshape(
        num_tiles, graphs_per_tile * n, graphs_per_tile * n)
    return x_flat, a_tiles


def init_params(key, d, out_dim):
    ks = jax.random.split(key, 18)
    half = d // 2

    raw = {
        "gcn_w": jax.random.normal(ks[0], (d, d), jnp.float32) * 0.2,       # [out, in]
        "gcn_b": jax.random.normal(ks[1], (d,), jnp.float32) * 0.1,
        "bn1_gamma": 1.0 + 0.1 * jax.random.normal(ks[2], (d,), jnp.float32),
        "bn1_beta": 0.1 * jax.random.normal(ks[3], (d,), jnp.float32),
        "bn1_mean": 0.1 * jax.random.normal(ks[4], (d,), jnp.float32),
        "bn1_var": jax.random.uniform(ks[5], (d,), jnp.float32, 0.5, 1.5),
        "bn2_gamma": 1.0 + 0.1 * jax.random.normal(ks[6], (d,), jnp.float32),
        "bn2_beta": 0.1 * jax.random.normal(ks[7], (d,), jnp.float32),
        "bn2_mean": 0.1 * jax.random.normal(ks[8], (d,), jnp.float32),
        "bn2_var": jax.random.uniform(ks[9], (d,), jnp.float32, 0.5, 1.5),
    }
    w_ih, b_ih, b_hh = [], [], []
    for l in range(NUM_LSTM_LAYERS):
        kw, kb1, kb2 = jax.random.split(ks[10 + l], 3)
        w_ih.append(jax.random.normal(kw, (4 * d, d), jnp.float32) * (1.0 / jnp.sqrt(d)))
        b_ih.append(jax.random.normal(kb1, (4 * d,), jnp.float32) * 0.1)
        b_hh.append(jax.random.normal(kb2, (4 * d,), jnp.float32) * 0.1)
    raw["lstm_w_ih"] = jnp.stack(w_ih)          # [3, 4D, D]
    raw["lstm_b_ih"] = jnp.stack(b_ih)
    raw["lstm_b_hh"] = jnp.stack(b_hh)
    raw["lin1_w"] = jax.random.normal(ks[13], (half, d), jnp.float32) * 0.2
    raw["lin1_b"] = jax.random.normal(ks[14], (half,), jnp.float32) * 0.1
    raw["lin2_w"] = jax.random.normal(ks[15], (out_dim, half), jnp.float32) * 0.2
    raw["lin2_b"] = jax.random.normal(ks[16], (out_dim,), jnp.float32) * 0.1

    # ---- host-side folds / packing for the kernel ----
    s1 = raw["bn1_gamma"] * jax.lax.rsqrt(raw["bn1_var"] + BN_EPS)
    t1 = raw["bn1_beta"] - raw["bn1_mean"] * s1
    s2 = raw["bn2_gamma"] * jax.lax.rsqrt(raw["bn2_var"] + BN_EPS)
    t2 = raw["bn2_beta"] - raw["bn2_mean"] * s2

    params = {
        # bn1 folded into GCN:  BN(A@X@W^T + b) == A@X@(W^T * s1) + (b*s1 + t1)   (exact, eval)
        "gcn_wt": raw["gcn_w"].T * s1[None, :],
        "gcn_b": (raw["gcn_b"] * s1 + t1)[None, :],
        "lstm_wt": jnp.transpose(raw["lstm_w_ih"], (0, 2, 1)),       # [3, D, 4D]  (W_ih^T)
        "lstm_b": raw["lstm_b_ih"] + raw["lstm_b_hh"],               # [3, 4D]
        "bn2_ss": jnp.stack([s2, t2]),                               # [2, D] scale, shift
        "lin1_wt": raw["lin1_w"].T,
        "lin1_b": raw["lin1_b"][None, :],
        "lin2_wt": raw["lin2_w"].T,
        "lin2_b": raw["lin2_b"][None, :],
    }
    return params, raw


def reference_forward(x, a_hat, raw):
    """Pure-JAX reference using the raw (unfolded) parameters."""
    g, n, d = x.shape

    def bn_eval(v, gamma, beta, mean, var):
        return (v - mean) * jax.lax.rsqrt(var + BN_EPS) * gamma + beta

    h = jnp.einsum('gnd,ed->gne', x, raw["gcn_w"])                    # X @ W^T
    h = jnp.einsum('gij,gjd->gid', a_hat, h) + raw["gcn_b"]
    h = bn_eval(h, raw["bn1_gamma"], raw["bn1_beta"], raw["bn1_mean"], raw["bn1_var"])
    h = jax.nn.relu(h).reshape(g * n, d)

    for layer in range(NUM_LSTM_LAYERS):
        gates = h @ raw["lstm_w_ih"][layer].T + raw["lstm_b_ih"][layer] + raw["lstm_b_hh"][layer]
        i_g, f_g, g_g, o_g = jnp.split(gates, 4, axis=1)
        c = jax.nn.sigmoid(i_g) * jnp.tanh(g_g)                       # c_prev = 0
        h = jax.nn.sigmoid(o_g) * jnp.tanh(c)

    h = bn_eval(h, raw["bn2_gamma"], raw["bn2_beta"], raw["bn2_mean"], raw["bn2_var"])
    h = jax.nn.relu(h)
    h = jax.nn.relu(h @ raw["lin1_w"].T + raw["lin1_b"])
    z = h @ raw["lin2_w"].T + raw["lin2_b"]
    return jax.nn.log_softmax(z, axis=1)


if __name__ == "__main__":
    key = jax.random.PRNGKey(0)
    k_x, k_p = jax.random.split(key)

    # Node features for NUM_GRAPHS graphs; each graph is a bidirectional ring on N_NODES nodes.
    x = jax.random.normal(k_x, (NUM_GRAPHS, N_NODES, INPUT_DIM), jnp.float32)
    idx = jnp.arange(N_NODES)
    edge_index = jnp.stack([
        jnp.concatenate([idx, (idx + 1) % N_NODES]),                  # sources
        jnp.concatenate([(idx + 1) % N_NODES, idx]),                  # targets
    ])
    a_hat = jnp.broadcast_to(build_gcn_adjacency(edge_index, N_NODES),
                             (NUM_GRAPHS, N_NODES, N_NODES))

    params, raw = init_params(k_p, INPUT_DIM, OUTPUT_DIM)
    x_flat, a_tiles = pack_inputs(x, a_hat, GRAPHS_PER_TILE)

    out = jax.block_until_ready(lstm_gcn_forward(x_flat, a_tiles, params))

    # Sanity: shape, finiteness, log_softmax rows exponentiate-sum to 1.
    assert out.shape == (NUM_GRAPHS * N_NODES, OUTPUT_DIM)
    assert bool(jnp.all(jnp.isfinite(out)))
    row_sums = jnp.sum(jnp.exp(out), axis=1)
    assert bool(jnp.all(jnp.abs(row_sums - 1.0) < 1e-3))

    # Correctness vs. pure-JAX reference (tolerance covers the approx-reciprocal sigmoid).
    ref = reference_forward(x, a_hat, raw)
    max_err = float(jnp.max(jnp.abs(out - ref)))
    assert max_err < 2e-2, f"mismatch vs reference: {max_err}"

    print("KERNEL_OK")
</pallas_src>

<mosaic_0001>
module attributes {stable_mosaic.version = 11 : i64} {
  func.func @lstm_gcn_kernel(%arg0: i32, %arg1: memref<128x32xf32, #tpu.memory_space<vmem>>, %arg2: memref<1x128x128xf32, #tpu.memory_space<vmem>>, %arg3: memref<32x32xf32, #tpu.memory_space<vmem>>, %arg4: memref<1x32xf32, #tpu.memory_space<vmem>>, %arg5: memref<3x32x128xf32, #tpu.memory_space<vmem>>, %arg6: memref<3x128xf32, #tpu.memory_space<vmem>>, %arg7: memref<2x32xf32, #tpu.memory_space<vmem>>, %arg8: memref<32x16xf32, #tpu.memory_space<vmem>>, %arg9: memref<1x16xf32, #tpu.memory_space<vmem>>, %arg10: memref<16x8xf32, #tpu.memory_space<vmem>>, %arg11: memref<1x8xf32, #tpu.memory_space<vmem>>, %arg12: memref<128x8xf32, #tpu.memory_space<vmem>>) attributes {dimension_semantics = [#tpu.dimension_semantics<parallel>], iteration_bounds = array<i64: 4>, scalar_prefetch = 0 : i64, scratch_operands = 0 : i64, tpu.core_type = #tpu.core_type<tc>, window_params = [{transform_indices = @transform_0, window_bounds = array<i64: 128, 32>}, {transform_indices = @transform_1, window_bounds = array<i64: 1, 128, 128>}, {pipeline_mode = #tpu.pipeline_mode<synchronous>, transform_indices = @transform_2, window_bounds = array<i64: 32, 32>}, {pipeline_mode = #tpu.pipeline_mode<synchronous>, transform_indices = @transform_3, window_bounds = array<i64: 1, 32>}, {pipeline_mode = #tpu.pipeline_mode<synchronous>, transform_indices = @transform_4, window_bounds = array<i64: 3, 32, 128>}, {pipeline_mode = #tpu.pipeline_mode<synchronous>, transform_indices = @transform_5, window_bounds = array<i64: 3, 128>}, {pipeline_mode = #tpu.pipeline_mode<synchronous>, transform_indices = @transform_6, window_bounds = array<i64: 2, 32>}, {pipeline_mode = #tpu.pipeline_mode<synchronous>, transform_indices = @transform_7, window_bounds = array<i64: 32, 16>}, {pipeline_mode = #tpu.pipeline_mode<synchronous>, transform_indices = @transform_8, window_bounds = array<i64: 1, 16>}, {pipeline_mode = #tpu.pipeline_mode<synchronous>, transform_indices = @transform_9, window_bounds = array<i64: 16, 8>}, {pipeline_mode = #tpu.pipeline_mode<synchronous>, transform_indices = @transform_10, window_bounds = array<i64: 1, 8>}, {transform_indices = @transform_11, window_bounds = array<i64: 128, 8>}]} {
    %c0 = arith.constant 0 : index
    %c0_0 = arith.constant 0 : index
    %0 = vector.load %arg1[%c0, %c0_0] : memref<128x32xf32, #tpu.memory_space<vmem>>, vector<128x32xf32>
    %c0_1 = arith.constant 0 : index
    %c0_2 = arith.constant 0 : index
    %c0_3 = arith.constant 0 : index
    %1 = vector.load %arg2[%c0_1, %c0_2, %c0_3] : memref<1x128x128xf32, #tpu.memory_space<vmem>>, vector<1x128x128xf32>
    %2 = vector.shape_cast %1 : vector<1x128x128xf32> to vector<128x128xf32>
    %c0_4 = arith.constant 0 : index
    %c0_5 = arith.constant 0 : index
    %3 = vector.load %arg3[%c0_4, %c0_5] : memref<32x32xf32, #tpu.memory_space<vmem>>, vector<32x32xf32>
    %cst = arith.constant dense<0.000000e+00> : vector<128x32xf32>
    %4 = tpu.matmul %0, %3, %cst {dimension_numbers = #tpu.dot_dimension_numbers<[1], [0], [0], [1], [0, 0, 1, 1], [], []>} : vector<128x32xf32>, vector<32x32xf32>, vector<128x32xf32> -> vector<128x32xf32>
    %cst_6 = arith.constant dense<0.000000e+00> : vector<128x32xf32>
    %5 = tpu.matmul %2, %4, %cst_6 {dimension_numbers = #tpu.dot_dimension_numbers<[1], [0], [0], [1], [0, 0, 1, 1], [], []>} : vector<128x128xf32>, vector<128x32xf32>, vector<128x32xf32> -> vector<128x32xf32>
    %c0_7 = arith.constant 0 : index
    %c0_8 = arith.constant 0 : index
    %6 = vector.load %arg4[%c0_7, %c0_8] : memref<1x32xf32, #tpu.memory_space<vmem>>, vector<1x32xf32>
    %7 = vector.broadcast %6 : vector<1x32xf32> to vector<128x32xf32>
    %8 = arith.addf %5, %7 : vector<128x32xf32>
    %cst_9 = arith.constant 0.000000e+00 : f32
    %9 = vector.broadcast %cst_9 : f32 to vector<128x32xf32>
    %10 = arith.maximumf %8, %9 : vector<128x32xf32>
    %c0_10 = arith.constant 0 : index
    %c0_11 = arith.constant 0 : index
    %11 = vector.load %arg6[%c0_10, %c0_11] : memref<3x128xf32, #tpu.memory_space<vmem>>, vector<3x128xf32>
    %c0_12 = arith.constant 0 : index
    %c0_13 = arith.constant 0 : index
    %c0_14 = arith.constant 0 : index
    %12 = vector.load %arg5[%c0_12, %c0_13, %c0_14] : memref<3x32x128xf32, #tpu.memory_space<vmem>>, vector<1x32x128xf32>
    %13 = vector.shape_cast %12 : vector<1x32x128xf32> to vector<32x128xf32>
    %cst_15 = arith.constant dense<0.000000e+00> : vector<128x128xf32>
    %14 = tpu.matmul %10, %13, %cst_15 {dimension_numbers = #tpu.dot_dimension_numbers<[1], [0], [0], [1], [0, 0, 1, 1], [], []>} : vector<128x32xf32>, vector<32x128xf32>, vector<128x128xf32> -> vector<128x128xf32>
    %15 = vector.extract_strided_slice %11 {offsets = [0, 0], sizes = [1, 128], strides = [1, 1]} : vector<3x128xf32> to vector<1x128xf32>
    %16 = vector.broadcast %15 : vector<1x128xf32> to vector<128x128xf32>
    %17 = arith.addf %14, %16 : vector<128x128xf32>
    %18 = vector.extract_strided_slice %17 {offsets = [0, 0], sizes = [128, 32], strides = [1, 1]} : vector<128x128xf32> to vector<128x32xf32>
    %cst_16 = arith.constant 0.000000e+00 : f32
    %19 = vector.broadcast %cst_16 : f32 to vector<128x32xf32>
    %20 = arith.subf %19, %18 : vector<128x32xf32>
    %21 = math.exp %20 : vector<128x32xf32>
    %cst_17 = arith.constant 1.000000e+00 : f32
    %22 = vector.broadcast %cst_17 : f32 to vector<128x32xf32>
    %23 = arith.addf %22, %21 : vector<128x32xf32>
    %24 = tpu.reciprocal %23 {approx = true} : vector<128x32xf32> -> vector<128x32xf32>
    %25 = vector.extract_strided_slice %17 {offsets = [0, 64], sizes = [128, 32], strides = [1, 1]} : vector<128x128xf32> to vector<128x32xf32>
    %26 = math.tanh %25 : vector<128x32xf32>
    %27 = vector.extract_strided_slice %17 {offsets = [0, 96], sizes = [128, 32], strides = [1, 1]} : vector<128x128xf32> to vector<128x32xf32>
    %cst_18 = arith.constant 0.000000e+00 : f32
    %28 = vector.broadcast %cst_18 : f32 to vector<128x32xf32>
    %29 = arith.subf %28, %27 : vector<128x32xf32>
    %30 = math.exp %29 : vector<128x32xf32>
    %cst_19 = arith.constant 1.000000e+00 : f32
    %31 = vector.broadcast %cst_19 : f32 to vector<128x32xf32>
    %32 = arith.addf %31, %30 : vector<128x32xf32>
    %33 = tpu.reciprocal %32 {approx = true} : vector<128x32xf32> -> vector<128x32xf32>
    %34 = arith.mulf %24, %26 : vector<128x32xf32>
    %35 = math.tanh %34 : vector<128x32xf32>
    %36 = arith.mulf %33, %35 : vector<128x32xf32>
    %c1 = arith.constant 1 : index
    %c0_20 = arith.constant 0 : index
    %c0_21 = arith.constant 0 : index
    %37 = vector.load %arg5[%c1, %c0_20, %c0_21] : memref<3x32x128xf32, #tpu.memory_space<vmem>>, vector<1x32x128xf32>
    %38 = vector.shape_cast %37 : vector<1x32x128xf32> to vector<32x128xf32>
    %cst_22 = arith.constant dense<0.000000e+00> : vector<128x128xf32>
    %39 = tpu.matmul %36, %38, %cst_22 {dimension_numbers = #tpu.dot_dimension_numbers<[1], [0], [0], [1], [0, 0, 1, 1], [], []>} : vector<128x32xf32>, vector<32x128xf32>, vector<128x128xf32> -> vector<128x128xf32>
    %40 = vector.extract_strided_slice %11 {offsets = [1, 0], sizes = [1, 128], strides = [1, 1]} : vector<3x128xf32> to vector<1x128xf32>
    %41 = vector.broadcast %40 : vector<1x128xf32> to vector<128x128xf32>
    %42 = arith.addf %39, %41 : vector<128x128xf32>
    %43 = vector.extract_strided_slice %42 {offsets = [0, 0], sizes = [128, 32], strides = [1, 1]} : vector<128x128xf32> to vector<128x32xf32>
    %cst_23 = arith.constant 0.000000e+00 : f32
    %44 = vector.broadcast %cst_23 : f32 to vector<128x32xf32>
    %45 = arith.subf %44, %43 : vector<128x32xf32>
    %46 = math.exp %45 : vector<128x32xf32>
    %cst_24 = arith.constant 1.000000e+00 : f32
    %47 = vector.broadcast %cst_24 : f32 to vector<128x32xf32>
    %48 = arith.addf %47, %46 : vector<128x32xf32>
    %49 = tpu.reciprocal %48 {approx = true} : vector<128x32xf32> -> vector<128x32xf32>
    %50 = vector.extract_strided_slice %42 {offsets = [0, 64], sizes = [128, 32], strides = [1, 1]} : vector<128x128xf32> to vector<128x32xf32>
    %51 = math.tanh %50 : vector<128x32xf32>
    %52 = vector.extract_strided_slice %42 {offsets = [0, 96], sizes = [128, 32], strides = [1, 1]} : vector<128x128xf32> to vector<128x32xf32>
    %cst_25 = arith.constant 0.000000e+00 : f32
    %53 = vector.broadcast %cst_25 : f32 to vector<128x32xf32>
    %54 = arith.subf %53, %52 : vector<128x32xf32>
    %55 = math.exp %54 : vector<128x32xf32>
    %cst_26 = arith.constant 1.000000e+00 : f32
    %56 = vector.broadcast %cst_26 : f32 to vector<128x32xf32>
    %57 = arith.addf %56, %55 : vector<128x32xf32>
    %58 = tpu.reciprocal %57 {approx = true} : vector<128x32xf32> -> vector<128x32xf32>
    %59 = arith.mulf %49, %51 : vector<128x32xf32>
    %60 = math.tanh %59 : vector<128x32xf32>
    %61 = arith.mulf %58, %60 : vector<128x32xf32>
    %c2 = arith.constant 2 : index
    %c0_27 = arith.constant 0 : index
    %c0_28 = arith.constant 0 : index
    %62 = vector.load %arg5[%c2, %c0_27, %c0_28] : memref<3x32x128xf32, #tpu.memory_space<vmem>>, vector<1x32x128xf32>
    %63 = vector.shape_cast %62 : vector<1x32x128xf32> to vector<32x128xf32>
    %cst_29 = arith.constant dense<0.000000e+00> : vector<128x128xf32>
    %64 = tpu.matmul %61, %63, %cst_29 {dimension_numbers = #tpu.dot_dimension_numbers<[1], [0], [0], [1], [0, 0, 1, 1], [], []>} : vector<128x32xf32>, vector<32x128xf32>, vector<128x128xf32> -> vector<128x128xf32>
    %65 = vector.extract_strided_slice %11 {offsets = [2, 0], sizes = [1, 128], strides = [1, 1]} : vector<3x128xf32> to vector<1x128xf32>
    %66 = vector.broadcast %65 : vector<1x128xf32> to vector<128x128xf32>
    %67 = arith.addf %64, %66 : vector<128x128xf32>
    %68 = vector.extract_strided_slice %67 {offsets = [0, 0], sizes = [128, 32], strides = [1, 1]} : vector<128x128xf32> to vector<128x32xf32>
    %cst_30 = arith.constant 0.000000e+00 : f32
    %69 = vector.broadcast %cst_30 : f32 to vector<128x32xf32>
    %70 = arith.subf %69, %68 : vector<128x32xf32>
    %71 = math.exp %70 : vector<128x32xf32>
    %cst_31 = arith.constant 1.000000e+00 : f32
    %72 = vector.broadcast %cst_31 : f32 to vector<128x32xf32>
    %73 = arith.addf %72, %71 : vector<128x32xf32>
    %74 = tpu.reciprocal %73 {approx = true} : vector<128x32xf32> -> vector<128x32xf32>
    %75 = vector.extract_strided_slice %67 {offsets = [0, 64], sizes = [128, 32], strides = [1, 1]} : vector<128x128xf32> to vector<128x32xf32>
    %76 = math.tanh %75 : vector<128x32xf32>
    %77 = vector.extract_strided_slice %67 {offsets = [0, 96], sizes = [128, 32], strides = [1, 1]} : vector<128x128xf32> to vector<128x32xf32>
    %cst_32 = arith.constant 0.000000e+00 : f32
    %78 = vector.broadcast %cst_32 : f32 to vector<128x32xf32>
    %79 = arith.subf %78, %77 : vector<128x32xf32>
    %80 = math.exp %79 : vector<128x32xf32>
    %cst_33 = arith.constant 1.000000e+00 : f32
    %81 = vector.broadcast %cst_33 : f32 to vector<128x32xf32>
    %82 = arith.addf %81, %80 : vector<128x32xf32>
    %83 = tpu.reciprocal %82 {approx = true} : vector<128x32xf32> -> vector<128x32xf32>
    %84 = arith.mulf %74, %76 : vector<128x32xf32>
    %85 = math.tanh %84 : vector<128x32xf32>
    %86 = arith.mulf %83, %85 : vector<128x32xf32>
    %c0_34 = arith.constant 0 : index
    %c0_35 = arith.constant 0 : index
    %87 = vector.load %arg7[%c0_34, %c0_35] : memref<2x32xf32, #tpu.memory_space<vmem>>, vector<2x32xf32>
    %88 = vector.extract_strided_slice %87 {offsets = [0, 0], sizes = [1, 32], strides = [1, 1]} : vector<2x32xf32> to vector<1x32xf32>
    %89 = vector.broadcast %88 : vector<1x32xf32> to vector<128x32xf32>
    %90 = arith.mulf %86, %89 : vector<128x32xf32>
    %91 = vector.extract_strided_slice %87 {offsets = [1, 0], sizes = [1, 32], strides = [1, 1]} : vector<2x32xf32> to vector<1x32xf32>
    %92 = vector.broadcast %91 : vector<1x32xf32> to vector<128x32xf32>
    %93 = arith.addf %90, %92 : vector<128x32xf32>
    %cst_36 = arith.constant 0.000000e+00 : f32
    %94 = vector.broadcast %cst_36 : f32 to vector<128x32xf32>
    %95 = arith.maximumf %93, %94 : vector<128x32xf32>
    %c0_37 = arith.constant 0 : index
    %c0_38 = arith.constant 0 : index
    %96 = vector.load %arg8[%c0_37, %c0_38] : memref<32x16xf32, #tpu.memory_space<vmem>>, vector<32x16xf32>
    %cst_39 = arith.constant dense<0.000000e+00> : vector<128x16xf32>
    %97 = tpu.matmul %95, %96, %cst_39 {dimension_numbers = #tpu.dot_dimension_numbers<[1], [0], [0], [1], [0, 0, 1, 1], [], []>} : vector<128x32xf32>, vector<32x16xf32>, vector<128x16xf32> -> vector<128x16xf32>
    %c0_40 = arith.constant 0 : index
    %c0_41 = arith.constant 0 : index
    %98 = vector.load %arg9[%c0_40, %c0_41] : memref<1x16xf32, #tpu.memory_space<vmem>>, vector<1x16xf32>
    %99 = vector.broadcast %98 : vector<1x16xf32> to vector<128x16xf32>
    %100 = arith.addf %97, %99 : vector<128x16xf32>
    %cst_42 = arith.constant 0.000000e+00 : f32
    %101 = vector.broadcast %cst_42 : f32 to vector<128x16xf32>
    %102 = arith.maximumf %100, %101 : vector<128x16xf32>
    %c0_43 = arith.constant 0 : index
    %c0_44 = arith.constant 0 : index
    %103 = vector.load %arg10[%c0_43, %c0_44] : memref<16x8xf32, #tpu.memory_space<vmem>>, vector<16x8xf32>
    %cst_45 = arith.constant dense<0.000000e+00> : vector<128x8xf32>
    %104 = tpu.matmul %102, %103, %cst_45 {dimension_numbers = #tpu.dot_dimension_numbers<[1], [0], [0], [1], [0, 0, 1, 1], [], []>} : vector<128x16xf32>, vector<16x8xf32>, vector<128x8xf32> -> vector<128x8xf32>
    %c0_46 = arith.constant 0 : index
    %c0_47 = arith.constant 0 : index
    %105 = vector.load %arg11[%c0_46, %c0_47] : memref<1x8xf32, #tpu.memory_space<vmem>>, vector<1x8xf32>
    %106 = vector.broadcast %105 : vector<1x8xf32> to vector<128x8xf32>
    %107 = arith.addf %104, %106 : vector<128x8xf32>
    %cst_48 = arith.constant dense<0xFF800000> : vector<128xf32>
    %108 = vector.multi_reduction <maximumf>, %107, %cst_48 [1] : vector<128x8xf32> to vector<128xf32>
    %109 = vector.shape_cast %108 : vector<128xf32> to vector<128x1xf32>
    %110 = vector.broadcast %109 : vector<128x1xf32> to vector<128x8xf32>
    %111 = arith.subf %107, %110 : vector<128x8xf32>
    %112 = math.exp %111 : vector<128x8xf32>
    %cst_49 = arith.constant dense<0.000000e+00> : vector<128xf32>
    %113 = vector.multi_reduction <add>, %112, %cst_49 [1] : vector<128x8xf32> to vector<128xf32>
    %114 = vector.shape_cast %113 : vector<128xf32> to vector<128x1xf32>
    %115 = math.log %114 : vector<128x1xf32>
    %116 = vector.broadcast %115 : vector<128x1xf32> to vector<128x8xf32>
    %117 = arith.subf %111, %116 : vector<128x8xf32>
    %c0_50 = arith.constant 0 : index
    %c0_51 = arith.constant 0 : index
    %118 = vector.load %arg12[%c0_50, %c0_51] : memref<128x8xf32, #tpu.memory_space<vmem>>, vector<128x8xf32>
    tpu.vector_store %arg12[%c0_50, %c0_51], %117 {strides = array<i32>} : memref<128x8xf32, #tpu.memory_space<vmem>>, vector<128x8xf32>,
    return
  }
  func.func @transform_0(%arg0: i32) -> (i32, i32) {
    %c0_i32 = arith.constant 0 : i32
    %c0_i32_0 = arith.constant 0 : i32
    return %arg0, %c0_i32 : i32, i32
  }
  func.func @transform_1(%arg0: i32) -> (i32, i32, i32) {
    %c0_i32 = arith.constant 0 : i32
    %c0_i32_0 = arith.constant 0 : i32
    %c0_i32_1 = arith.constant 0 : i32
    return %arg0, %c0_i32, %c0_i32_0 : i32, i32, i32
  }
  func.func @transform_2(%arg0: i32) -> (i32, i32) {
    %c0_i32 = arith.constant 0 : i32
    %c0_i32_0 = arith.constant 0 : i32
    %c0_i32_1 = arith.constant 0 : i32
    return %c0_i32, %c0_i32_0 : i32, i32
  }
  func.func @transform_3(%arg0: i32) -> (i32, i32) {
    %c0_i32 = arith.constant 0 : i32
    %c0_i32_0 = arith.constant 0 : i32
    %c0_i32_1 = arith.constant 0 : i32
    return %c0_i32, %c0_i32_0 : i32, i32
  }
  func.func @transform_4(%arg0: i32) -> (i32, i32, i32) {
    %c0_i32 = arith.constant 0 : i32
    %c0_i32_0 = arith.constant 0 : i32
    %c0_i32_1 = arith.constant 0 : i32
    %c0_i32_2 = arith.constant 0 : i32
    return %c0_i32, %c0_i32_0, %c0_i32_1 : i32, i32, i32
  }
  func.func @transform_5(%arg0: i32) -> (i32, i32) {
    %c0_i32 = arith.constant 0 : i32
    %c0_i32_0 = arith.constant 0 : i32
    %c0_i32_1 = arith.constant 0 : i32
    return %c0_i32, %c0_i32_0 : i32, i32
  }
  func.func @transform_6(%arg0: i32) -> (i32, i32) {
    %c0_i32 = arith.constant 0 : i32
    %c0_i32_0 = arith.constant 0 : i32
    %c0_i32_1 = arith.constant 0 : i32
    return %c0_i32, %c0_i32_0 : i32, i32
  }
  func.func @transform_7(%arg0: i32) -> (i32, i32) {
    %c0_i32 = arith.constant 0 : i32
    %c0_i32_0 = arith.constant 0 : i32
    %c0_i32_1 = arith.constant 0 : i32
    return %c0_i32, %c0_i32_0 : i32, i32
  }
  func.func @transform_8(%arg0: i32) -> (i32, i32) {
    %c0_i32 = arith.constant 0 : i32
    %c0_i32_0 = arith.constant 0 : i32
    %c0_i32_1 = arith.constant 0 : i32
    return %c0_i32, %c0_i32_0 : i32, i32
  }
  func.func @transform_9(%arg0: i32) -> (i32, i32) {
    %c0_i32 = arith.constant 0 : i32
    %c0_i32_0 = arith.constant 0 : i32
    %c0_i32_1 = arith.constant 0 : i32
    return %c0_i32, %c0_i32_0 : i32, i32
  }
  func.func @transform_10(%arg0: i32) -> (i32, i32) {
    %c0_i32 = arith.constant 0 : i32
    %c0_i32_0 = arith.constant 0 : i32
    %c0_i32_1 = arith.constant 0 : i32
    return %c0_i32, %c0_i32_0 : i32, i32
  }
  func.func @transform_11(%arg0: i32) -> (i32, i32) {
    %c0_i32 = arith.constant 0 : i32
    %c0_i32_0 = arith.constant 0 : i32
    return %arg0, %c0_i32 : i32, i32
  }
}

</mosaic_0001>

<bundles_post_ra>
// kernel: tpu_custom_call.1
= control target key start
LH: loop header
LB: loop body
LE: loop exit
PB: predicated region body
PF: predicated region fallthrough
CT: control target
= control target key end

     0   :  { %s4141_s17 = smov 0   ;;  %s5224_s0 = inlined_call_operand.vmem [shape: f32[512,32], index: 0, kind: input, shape index: {}]   ;;  %s5225_s1 = inlined_call_operand.vmem [shape: f32[4,128,128], index: 1, kind: input, shape index: {}]   ;;  %s5226_s2 = inlined_call_operand.vmem [shape: f32[32,32], index: 2, kind: input, shape index: {}]   ;;  %s5227_s3 = inlined_call_operand.vmem [shape: f32[1,32], index: 3, kind: input, shape index: {}]   ;;  %s5228_s4 = inlined_call_operand.vmem [shape: f32[3,32,128], index: 4, kind: input, shape index: {}]   ;;  %s5229_s5 = inlined_call_operand.vmem [shape: f32[3,128], index: 5, kind: input, shape index: {}]   ;;  %s5230_s6 = inlined_call_operand.vmem [shape: f32[2,32], index: 6, kind: input, shape index: {}]   ;;  %s5231_s7 = inlined_call_operand.vmem [shape: f32[32,16], index: 7, kind: input, shape index: {}]   ;;  %s5232_s8 = inlined_call_operand.vmem [shape: f32[1,16], index: 8, kind: input, shape index: {}]   ;;  %s5233_s9 = inlined_call_operand.vmem [shape: f32[16,8], index: 9, kind: input, shape index: {}]   ;;  %s5234_s10 = inlined_call_operand.vmem [shape: f32[1,8], index: 10, kind: input, shape index: {}]   ;;  %s5235_s11 = inlined_call_operand.vmem [shape: f32[512,8], index: 11, kind: output, shape index: {}]  }
   0x1 LB: > { %s4147_s18 = sadd.s32 4294967295, %s4076_s17   ;;  %p3095_p0 = scmp.ge.s32.totalorder %s4076_s17, 1  ;;  %s4076_s17 = sphi %s4141_s17, %s21_s17  }
   0x2   : > { %p348_p1 = scmp.lt.s32.totalorder %s4076_s17, 5 }
   0x4   : > { %p349_p2 = pnand %p3095_p0, %p348_p1 }
   0x5   : > { %s3096_s23 = sshll.u32 (!%p349_p2), %s4147_s18, 4  ;;  %p399_p4 = scmp.lt.s32.totalorder (!%p349_p2), %s4147_s18, 3 }
   0x6   : > { %352 = sbr.rel (%p349_p2) target bundleno = 2958 (0xb8e), region = 64  ;;  %p394_p3 = scmp.lt.s32.totalorder (!%p349_p2), %s3096_s23, 63 }
   0x7   : > { %s4079_s14 = smov (!%p349_p2), 96   ;;  %s4080_s25 = smov (!%p349_p2), 32  }
   0xb   : > { %v445_v0 = vld [vmem:[%s5226_s2 + $0x18] sm:$0xff]  ;;  %v444_v1 = vld [vmem:[%s5226_s2 + $0x10] sm:$0xff]  ;;  %v443_v2 = vld [vmem:[%s5226_s2 + $0x8] sm:$0xff]  ;;  %s5237_s23 = smov (!%p394_p3, %s3096_s23), 63  ;;  %vm446_vm0 = vcmask 261120   ;;  %s5239_s18 = smov (!%p399_p4, %s4147_s18), 3 }
   0xc   : > { %3362 = vmatprep.subr.mxu0 %v445_v0  ;;  %v442_v3 = vld [vmem:[%s5226_s2] sm:$0xff]  ;;  %s3097_s28 = sshll.u32 %s5237_s23, 3  ;;  %s3211_s13 = sshll.u32 %s5239_s18, 7  ;;  %v812_v21 = vld [vmem:[%s5228_s4 + $0x18] sm:$0xff]  ;;  %v811_v22 = vld [vmem:[%s5228_s4 + $0x10] sm:$0xff]  ;;  %vm2620_vm1 = vcmask 130048  }
   0xd   : > { %3363 = vmatpush3.msra.mxu0 %v445_v0  ;;  %s4172_s12 = scalar_lea.vmem %s5224_s0, %s3097_s28  ;;  %s4211_s16 = scalar_lea.vmem %s5225_s1, %s3211_s13  ;;  %v810_v23 = vld [vmem:[%s5228_s4 + $0x8] sm:$0xff]  ;;  %v809_v24 = vld [vmem:[%s5228_s4] sm:$0xff]  ;;  %vm2814_vm2 = vcmask 64512  }
   0xe   : > { %3364 = vmatprep.subr.mxu0 %v444_v1  ;;  %v410_v4 = vld [vmem:[%s4172_s12] sm:$0xff]  ;;  %v411_v5 = vld [vmem:[%s4172_s12 + $0x8] sm:$0xff]  ;;  %v412_v6 = vld [vmem:[%s4172_s12 + $0x10] sm:$0xff]  ;;  %s4078_s13 = smov 64   ;;  %s5171_s26 = scalar_lea.vmem %s5235_s11, %s3097_s28 }
   0xf   : > { %3365 = vmatpush3.msra.mxu0 %v444_v1  ;;  %3370 = vmatprep.mubr.msk.f32.mxu0 %vm446_vm0, %v410_v4  ;;  %v413_v7 = vld [vmem:[%s4172_s12 + $0x18] sm:$0xff]  ;;  %v414_v8 = vld [vmem:[%s4172_s12 + $0x20] sm:$0xff]  ;;  %v415_v9 = vld [vmem:[%s4172_s12 + $0x28] sm:$0xff] }
  0x10   : > { %3366 = vmatprep.subr.mxu0 %v443_v2  ;;  %v416_v10 = vld [vmem:[%s4172_s12 + $0x30] sm:$0xff]  ;;  %v417_v11 = vld [vmem:[%s4172_s12 + $0x38] sm:$0xff]  ;;  %v418_v12 = vld [vmem:[%s4172_s12 + $0x40] sm:$0xff] }
  0x11   : > { %3367 = vmatpush3.msra.mxu0 %v443_v2  ;;  %v419_v13 = vld [vmem:[%s4172_s12 + $0x48] sm:$0xff]  ;;  %v420_v14 = vld [vmem:[%s4172_s12 + $0x50] sm:$0xff]  ;;  %v421_v15 = vld [vmem:[%s4172_s12 + $0x58] sm:$0xff] }
  0x12   : > { %3368 = vmatprep.subr.mxu0 %v442_v3  ;;  %v422_v16 = vld [vmem:[%s4172_s12 + $0x60] sm:$0xff]  ;;  %v423_v17 = vld [vmem:[%s4172_s12 + $0x68] sm:$0xff]  ;;  %v424_v18 = vld [vmem:[%s4172_s12 + $0x70] sm:$0xff] }
  0x13   : > { %3369 = vmatpush3.msra.mxu0 %v442_v3  ;;  %v425_v19 = vld [vmem:[%s4172_s12 + $0x78] sm:$0xff]  ;;  %v426_v20 = vld [vmem:[%s4211_s16] sm:$0xff]  ;;  %v427_v41 = vld [vmem:[%s4211_s16 + $0x8] sm:$0xff] }
  0x14   : > { %3371 = vmatmul.mubr.msk.f32.vlgmr.msra.gmra.mxu0 %vm446_vm0, %v411_v5  ;;  %3426 = vmatprep.mubr.f32.mxu1 %v426_v20  ;;  %v428_v42 = vld [vmem:[%s4211_s16 + $0x10] sm:$0xff]  ;;  %v429_v43 = vld [vmem:[%s4211_s16 + $0x18] sm:$0xff]  ;;  %v430_v44 = vld [vmem:[%s4211_s16 + $0x20] sm:$0xff] }
  0x15   : > { %3373 = vmatprep.mubr.msk.f32.mxu0 %vm446_vm0, %v412_v6  ;;  %3450 = vmatprep.subr.mxu0 %v812_v21  ;;  %v431_v45 = vld [vmem:[%s4211_s16 + $0x28] sm:$0xff]  ;;  %v432_v46 = vld [vmem:[%s4211_s16 + $0x30] sm:$0xff]  ;;  %v433_v47 = vld [vmem:[%s4211_s16 + $0x38] sm:$0xff] }
  0x16   : > { %3451 = vmatpush3.msra.mxu0 %v812_v21  ;;  %v434_v48 = vld [vmem:[%s4211_s16 + $0x40] sm:$0xff]  ;;  %v435_v49 = vld [vmem:[%s4211_s16 + $0x48] sm:$0xff]  ;;  %v436_v50 = vld [vmem:[%s4211_s16 + $0x50] sm:$0xff] }
  0x17   : > { %3452 = vmatprep.subr.mxu0 %v811_v22  ;;  %v437_v51 = vld [vmem:[%s4211_s16 + $0x58] sm:$0xff]  ;;  %v438_v52 = vld [vmem:[%s4211_s16 + $0x60] sm:$0xff]  ;;  %v439_v53 = vld [vmem:[%s4211_s16 + $0x68] sm:$0xff] }
  0x18   : > { %3374 = vmatmul.mubr.msk.f32.gmra.mxu0 %vm446_vm0, %v413_v7  ;;  %v440_v54 = vld [vmem:[%s4211_s16 + $0x70] sm:$0xff]  ;;  %v441_v55 = vld [vmem:[%s4211_s16 + $0x78] sm:$0xff]  ;;  %v3118_v56 = vld [vmem:[%s5227_s3] ss:$0 sm:$0xff] }
  0x19   : > { %3376 = vmatprep.mubr.msk.f32.mxu0 %vm446_vm0, %v414_v8  ;;  %3453 = vmatpush3.msra.mxu0 %v811_v22 }
  0x1a   : > { %3454 = vmatprep.subr.mxu0 %v810_v23 }
  0x1b   : > { %3455 = vmatpush3.msra.mxu0 %v810_v23 }
  0x1c   : > { %3377 = vmatmul.mubr.msk.f32.gmra.mxu0 %vm446_vm0, %v415_v9  ;;  %3456 = vmatprep.subr.mxu0 %v809_v24 }
  0x1d   : > { %3379 = vmatprep.mubr.msk.f32.mxu0 %vm446_vm0, %v416_v10  ;;  %3457 = vmatpush3.msra.mxu0 %v809_v24 }
  0x20   : > { %3380 = vmatmul.mubr.msk.f32.gmra.mxu0 %vm446_vm0, %v417_v11 }
  0x21   : > { %3382 = vmatprep.mubr.msk.f32.mxu0 %vm446_vm0, %v418_v12 }
  0x24   : > { %3383 = vmatmul.mubr.msk.f32.gmra.mxu0 %vm446_vm0, %v419_v13 }
  0x25   : > { %3385 = vmatprep.mubr.msk.f32.mxu0 %vm446_vm0, %v420_v14 }
  0x28   : > { %3386 = vmatmul.mubr.msk.f32.gmra.mxu0 %vm446_vm0, %v421_v15 }
  0x29   : > { %3388 = vmatprep.mubr.msk.f32.mxu0 %vm446_vm0, %v422_v16 }
  0x2c   : > { %3389 = vmatmul.mubr.msk.f32.gmra.mxu0 %vm446_vm0, %v423_v17 }
  0x2d   : > { %3391 = vmatprep.mubr.msk.f32.mxu0 %vm446_vm0, %v424_v18 }
  0x30   : > { %3392 = vmatmul.mubr.msk.f32.gmra.mxu0 %vm446_vm0, %v425_v19 }
  0xd4   : > { %v3372_v25 = vpop.f32.mrf.mxu0 }
  0xd6   : > { %v561_v26 = vpop.f32.mrf.mxu0 }
  0xd8   : > { %v3375_v27 = vpop.f32.mrf.mxu0 }
  0xda   : > { %v571_v28 = vpop.f32.mrf.mxu0 }
  0xdc   : > { %v3378_v29 = vpop.f32.mrf.mxu0 }
  0xde   : > { %v581_v30 = vpop.f32.mrf.mxu0 }
  0xe0   : > { %v3381_v31 = vpop.f32.mrf.mxu0 }
  0xe2   : > { %v591_v32 = vpop.f32.mrf.mxu0 }
  0xe4   : > { %v3384_v33 = vpop.f32.mrf.mxu0 }
  0xe6   : > { %v601_v34 = vpop.f32.mrf.mxu0 }
  0xe8   : > { %v3387_v35 = vpop.f32.mrf.mxu0 }
  0xea   : > { %v611_v36 = vpop.f32.mrf.mxu0 }
  0xec   : > { %v3390_v37 = vpop.f32.mrf.mxu0 }
  0xee   : > { %v621_v38 = vpop.f32.mrf.mxu0 }
  0xf0   : > { %v3393_v39 = vpop.f32.mrf.mxu0 }
  0xf1   : > { %3394 = vmatprep.subr.mxu1 %v3393_v39 }
  0xf2   : > { %v631_v40 = vpop.f32.mrf.mxu0  ;;  %3395 = vmatpush3.msra.mxu1 %v3393_v39 }
  0xf3   : > { %3396 = vmatprep.subr.mxu1 %v631_v40 }
  0xf4   : > { %3397 = vmatpush3.msra.mxu1 %v631_v40 }
  0xf5   : > { %3398 = vmatprep.subr.mxu1 %v3390_v37 }
  0xf6   : > { %3399 = vmatpush3.msra.mxu1 %v3390_v37 }
  0xf7   : > { %3400 = vmatprep.subr.mxu1 %v621_v38 }
  0xf8   : > { %3401 = vmatpush3.msra.mxu1 %v621_v38 }
  0xf9   : > { %3402 = vmatprep.subr.mxu1 %v3387_v35 }
  0xfa   : > { %3403 = vmatpush3.msra.mxu1 %v3387_v35 }
  0xfb   : > { %3404 = vmatprep.subr.mxu1 %v611_v36 }
  0xfc   : > { %3405 = vmatpush3.msra.mxu1 %v611_v36 }
  0xfd   : > { %3406 = vmatprep.subr.mxu1 %v3384_v33 }
  0xfe   : > { %3407 = vmatpush3.msra.mxu1 %v3384_v33 }
  0xff   : > { %3408 = vmatprep.subr.mxu1 %v601_v34 }
 0x100   : > { %3409 = vmatpush3.msra.mxu1 %v601_v34 }
 0x101   : > { %3410 = vmatprep.subr.mxu1 %v3381_v31 }
 0x102   : > { %3411 = vmatpush3.msra.mxu1 %v3381_v31 }
 0x103   : > { %3412 = vmatprep.subr.mxu1 %v591_v32 }
 0x104   : > { %3413 = vmatpush3.msra.mxu1 %v591_v32 }
 0x105   : > { %3414 = vmatprep.subr.mxu1 %v3378_v29 }
 0x106   : > { %3415 = vmatpush3.msra.mxu1 %v3378_v29 }
 0x107   : > { %3416 = vmatprep.subr.mxu1 %v581_v30 }
 0x108   : > { %3417 = vmatpush3.msra.mxu1 %v581_v30 }
 0x109   : > { %3418 = vmatprep.subr.mxu1 %v3375_v27 }
 0x10a   : > { %3419 = vmatpush3.msra.mxu1 %v3375_v27 }
 0x10b   : > { %3420 = vmatprep.subr.mxu1 %v571_v28 }
 0x10c   : > { %3421 = vmatpush3.msra.mxu1 %v571_v28 }
 0x10d   : > { %3422 = vmatprep.subr.mxu1 %v3372_v25 }
 0x10e   : > { %3423 = vmatpush3.msra.mxu1 %v3372_v25 }
 0x10f   : > { %3424 = vmatprep.subr.mxu1 %v561_v26 }
 0x110   : > { %3425 = vmatpush3.msra.mxu1 %v561_v26 }
 0x111   : > { %3427 = vmatmul.mubr.f32.vlgmr.msra.gmra.mxu1 %v427_v41  ;;  %v813_v41 = vlaneseq }
 0x112   : > { %3429 = vmatprep.mubr.f32.mxu1 %v428_v42 }
 0x113   : > { %v4260_v42 = vshrl.u32 %v813_v41, 7 }
 0x115   : > { %3430 = vmatmul.mubr.f32.gmra.mxu1 %v429_v43  ;;  %v815_v43 = vsub.s32 0, %v4260_v42 }
 0x116   : > { %3432 = vmatprep.mubr.f32.mxu1 %v430_v44  ;;  %v4266_v44 = vld [vmem:[%s5229_s5] sm:$0x7] }
 0x119   : > { %3433 = vmatmul.mubr.f32.gmra.mxu1 %v431_v45 }
 0x11a   : > { %3435 = vmatprep.mubr.f32.mxu1 %v432_v46  ;;  %v4271_v46 = vrot.slane %v4266_v44, %v815_v43 }
 0x11d   : > { %3436 = vmatmul.mubr.f32.gmra.mxu1 %v433_v47 }
 0x11e   : > { %3438 = vmatprep.mubr.f32.mxu1 %v434_v48 }
 0x121   : > { %3439 = vmatmul.mubr.f32.gmra.mxu1 %v435_v49 }
 0x122   : > { %3441 = vmatprep.mubr.f32.mxu1 %v436_v50 }
 0x125   : > { %3442 = vmatmul.mubr.f32.gmra.mxu1 %v437_v51 }
 0x126   : > { %3444 = vmatprep.mubr.f32.mxu1 %v438_v52 }
 0x129   : > { %3445 = vmatmul.mubr.f32.gmra.mxu1 %v439_v53 }
 0x12a   : > { %3447 = vmatprep.mubr.f32.mxu1 %v440_v54 }
 0x12d   : > { %3448 = vmatmul.mubr.f32.gmra.mxu1 %v441_v55 }
 0x1d1   : > { %v3428_v57 = vpop.f32.mrf.mxu1 }
 0x1d2   : > { %v719_v58 = vadd.f32 %v3428_v57, %v3118_v56 }
 0x1d3   : > { %v713_v59 = vpop.f32.mrf.mxu1 }
 0x1d4   : > { %v714_v60 = vadd.f32 %v3118_v56, %v713_v59  ;;  %v793_v63 = vmax.f32 %v719_v58, 0.0 }
 0x1d5   : > { %v3431_v61 = vpop.f32.mrf.mxu1 }
 0x1d6   : > { %v792_v62 = vmax.f32 %v714_v60, 0.0  ;;  %v729_v0 = vadd.f32 %v3431_v61, %v3118_v56 }
 0x1d7   : > { %v723_v1 = vpop.f32.mrf.mxu1 }
 0x1d8   : > { %v724_v2 = vadd.f32 %v3118_v56, %v723_v1  ;;  %3458 = vmatprep.mubr.msk.f32.mxu0 %vm446_vm0, %v792_v62  ;;  %v795_v6 = vmax.f32 %v729_v0, 0.0 }
 0x1d9   : > { %v3434_v3 = vpop.f32.mrf.mxu1  ;;  %3459 = vmatmul.mubr.msk.f32.vlgmr.msra.gmra.mxu0 %vm446_vm0, %v793_v63 }
 0x1da   : > { %v794_v4 = vmax.f32 %v724_v2, 0.0  ;;  %v739_v5 = vadd.f32 %v3434_v3, %v3118_v56 }
 0x1db   : > { %v733_v7 = vpop.f32.mrf.mxu1 }
 0x1dc   : > { %v734_v8 = vadd.f32 %v3118_v56, %v733_v7  ;;  %3461 = vmatprep.mubr.msk.f32.mxu0 %vm446_vm0, %v794_v4  ;;  %v797_v9 = vmax.f32 %v739_v5, 0.0 }
 0x1dd   : > { %v3437_v10 = vpop.f32.mrf.mxu1  ;;  %3462 = vmatmul.mubr.msk.f32.gmra.mxu0 %vm446_vm0, %v795_v6 }
 0x1de   : > { %v796_v11 = vmax.f32 %v734_v8, 0.0  ;;  %v749_v12 = vadd.f32 %v3437_v10, %v3118_v56 }
 0x1df   : > { %v743_v13 = vpop.f32.mrf.mxu1 }
 0x1e0   : > { %v744_v14 = vadd.f32 %v3118_v56, %v743_v13  ;;  %3464 = vmatprep.mubr.msk.f32.mxu0 %vm446_vm0, %v796_v11  ;;  %v799_v15 = vmax.f32 %v749_v12, 0.0 }
 0x1e1   : > { %v3440_v16 = vpop.f32.mrf.mxu1  ;;  %3465 = vmatmul.mubr.msk.f32.gmra.mxu0 %vm446_vm0, %v797_v9 }
 0x1e2   : > { %v798_v17 = vmax.f32 %v744_v14, 0.0  ;;  %v759_v18 = vadd.f32 %v3440_v16, %v3118_v56 }
 0x1e3   : > { %v753_v19 = vpop.f32.mrf.mxu1 }
 0x1e4   : > { %v754_v20 = vadd.f32 %v3118_v56, %v753_v19  ;;  %3467 = vmatprep.mubr.msk.f32.mxu0 %vm446_vm0, %v798_v17  ;;  %v801_v21 = vmax.f32 %v759_v18, 0.0 }
 0x1e5   : > { %v3443_v22 = vpop.f32.mrf.mxu1  ;;  %3468 = vmatmul.mubr.msk.f32.gmra.mxu0 %vm446_vm0, %v799_v15 }
 0x1e6   : > { %v800_v23 = vmax.f32 %v754_v20, 0.0  ;;  %v769_v24 = vadd.f32 %v3443_v22, %v3118_v56 }
 0x1e7   : > { %v763_v25 = vpop.f32.mrf.mxu1 }
 0x1e8   : > { %v764_v26 = vadd.f32 %v3118_v56, %v763_v25  ;;  %3470 = vmatprep.mubr.msk.f32.mxu0 %vm446_vm0, %v800_v23  ;;  %v803_v27 = vmax.f32 %v769_v24, 0.0 }
 0x1e9   : > { %v3446_v28 = vpop.f32.mrf.mxu1  ;;  %3471 = vmatmul.mubr.msk.f32.gmra.mxu0 %vm446_vm0, %v801_v21 }
 0x1ea   : > { %v802_v29 = vmax.f32 %v764_v26, 0.0  ;;  %v779_v30 = vadd.f32 %v3446_v28, %v3118_v56 }
 0x1eb   : > { %v773_v31 = vpop.f32.mrf.mxu1 }
 0x1ec   : > { %v774_v32 = vadd.f32 %v3118_v56, %v773_v31  ;;  %3473 = vmatprep.mubr.msk.f32.mxu0 %vm446_vm0, %v802_v29  ;;  %v805_v33 = vmax.f32 %v779_v30, 0.0 }
 0x1ed   : > { %v3449_v34 = vpop.f32.mrf.mxu1  ;;  %3474 = vmatmul.mubr.msk.f32.gmra.mxu0 %vm446_vm0, %v803_v27 }
 0x1ee   : > { %v804_v35 = vmax.f32 %v774_v32, 0.0  ;;  %v789_v36 = vadd.f32 %v3449_v34, %v3118_v56 }
 0x1ef   : > { %v783_v37 = vpop.f32.mrf.mxu1 }
 0x1f0   : > { %v784_v38 = vadd.f32 %v3118_v56, %v783_v37  ;;  %3476 = vmatprep.mubr.msk.f32.mxu0 %vm446_vm0, %v804_v35  ;;  %v807_v39 = vmax.f32 %v789_v36, 0.0 }
 0x1f1   : > { %3477 = vmatmul.mubr.msk.f32.gmra.mxu0 %vm446_vm0, %v805_v33 }
 0x1f2   : > { %v806_v40 = vmax.f32 %v784_v38, 0.0 }
 0x1f4   : > { %3479 = vmatprep.mubr.msk.f32.mxu0 %vm446_vm0, %v806_v40 }
 0x1f5   : > { %3480 = vmatmul.mubr.msk.f32.gmra.mxu0 %vm446_vm0, %v807_v39 }
 0x299   : > { %v3460_v45 = vpop.f32.mrf.mxu0 }
 0x29a   : > { %v4277_v50 = vadd.f32 %v3460_v45, %v4271_v46 }
 0x29b   : > { %v931_v47 = vpop.f32.mrf.mxu0 }
 0x29c   : > { %v4274_v48 = vadd.f32 %v931_v47, %v4271_v46  ;;  %v1011_v31 = vsub.f32 0.0, %v4277_v50 }
 0x29d   : > { %v3463_v49 = vpop.f32.mrf.mxu0 }
 0x29e   : > { %3621 = vtanh.f32 %v4274_v48  ;;  %v4285_v54 = vadd.f32 %v3463_v49, %v4271_v46  ;;  %v1010_v30 = vsub.f32 0.0, %v4274_v48  ;;  %v1028_v34 = vmul.f32 1.442695, %v1011_v31 }
 0x29f   : > { %v941_v51 = vpop.f32.mrf.mxu0  ;;  %3623 = vtanh.f32 %v4277_v50 }
 0x2a0   : > { %v4281_v52 = vadd.f32 %v941_v51, %v4271_v46  ;;  %v1026_v32 = vmul.f32 1.442695, %v1010_v30  ;;  %v1013_v35 = vsub.f32 0.0, %v4285_v54 }
 0x2a1   : > { %v3466_v53 = vpop.f32.mrf.mxu0 }
 0x2a2   : > { %3625 = vtanh.f32 %v4281_v52  ;;  %v4292_v57 = vadd.f32 %v3466_v53, %v4271_v46  ;;  %v1012_v33 = vsub.f32 0.0, %v4281_v52  ;;  %v1032_v38 = vmul.f32 1.442695, %v1013_v35 }
 0x2a3   : > { %v951_v55 = vpop.f32.mrf.mxu0  ;;  %3627 = vtanh.f32 %v4285_v54 }
 0x2a4   : > { %v4289_v56 = vadd.f32 %v951_v55, %v4271_v46  ;;  %v1030_v36 = vmul.f32 1.442695, %v1012_v33  ;;  %v1015_v39 = vsub.f32 0.0, %v4292_v57 }
 0x2a5   : > { %v3469_v58 = vpop.f32.mrf.mxu0 }
 0x2a6   : > { %3629 = vtanh.f32 %v4289_v56  ;;  %v4301_v61 = vadd.f32 %v3469_v58, %v4271_v46  ;;  %v1014_v37 = vsub.f32 0.0, %v4289_v56 }
 0x2a7   : > { %v961_v59 = vpop.f32.mrf.mxu0  ;;  %3631 = vtanh.f32 %v4292_v57 }
 0x2a8   : > { %v4297_v60 = vadd.f32 %v961_v59, %v4271_v46  ;;  %v1034_v40 = vmul.f32 1.442695, %v1014_v37  ;;  %v1017_v45 = vsub.f32 0.0, %v4301_v61 }
 0x2a9   : > { %v3472_v62 = vpop.f32.mrf.mxu0 }
 0x2aa   : > { %3633 = vtanh.f32 %v4297_v60  ;;  %v4310_v2 = vadd.f32 %v3472_v62, %v4271_v46  ;;  %v1016_v41 = vsub.f32 0.0, %v4297_v60  ;;  %v1040_v49 = vmul.f32 1.442695, %v1017_v45 }
 0x2ab   : > { %v3622_v63 = vpop.eup %3621  ;;  %v971_v0 = vpop.f32.mrf.mxu0  ;;  %3635 = vtanh.f32 %v4301_v61 }
 0x2ac   : > { %v4305_v1 = vadd.f32 %v971_v0, %v4271_v46  ;;  %1122 = vrot.lane.b32.xlu0 %v3622_v63, %s4078_s13  ;;  %v3624_v4 = vpop.eup %3623  ;;  %v1038_v47 = vmul.f32 1.442695, %v1016_v41  ;;  %v1019_v50 = vsub.f32 0.0, %v4310_v2 }
 0x2ad   : > { %v3475_v3 = vpop.f32.mrf.mxu0 }
 0x2ae   : > { %3637 = vtanh.f32 %v4305_v1  ;;  %v4317_v8 = vadd.f32 %v3475_v3, %v4271_v46  ;;  %v1018_v48 = vsub.f32 0.0, %v4305_v1  ;;  %v1044_v53 = vmul.f32 1.442695, %v1019_v50 }
 0x2af   : > { %v3626_v5 = vpop.eup %3625  ;;  %3639 = vtanh.f32 %v4310_v2  ;;  %v981_v6 = vpop.f32.mrf.mxu0 }
 0x2b0   : > { %1124 = vrot.lane.b32.xlu0 %v3624_v4, %s4078_s13  ;;  %1126 = vrot.lane.b32.xlu1 %v3626_v5, %s4078_s13  ;;  %v3628_v7 = vpop.eup %3627  ;;  %3641 = vtanh.f32 %v4317_v8  ;;  %v4323_v12 = vadd.f32 %v981_v6, %v4271_v46  ;;  %v1042_v52 = vmul.f32 1.442695, %v1018_v48  ;;  %v1021_v56 = vsub.f32 0.0, %v4317_v8 }
 0x2b1   : > { %v3478_v10 = vpop.f32.mrf.mxu0 }
 0x2b2   : > { %3643 = vtanh.f32 %v4323_v12  ;;  %v4329_v16 = vadd.f32 %v3478_v10, %v4271_v46  ;;  %v1048_v60 = vmul.f32 1.442695, %v1021_v56  ;;  %v1020_v61 = vsub.f32 0.0, %v4323_v12 }
 0x2b3   : > { %v3630_v9 = vpop.eup %3629  ;;  %v991_v14 = vpop.f32.mrf.mxu0 }
 0x2b4   : > { %1128 = vrot.lane.b32.xlu1 %v3628_v7, %s4078_s13  ;;  %1130 = vrot.lane.b32.xlu0 %v3630_v9, %s4078_s13  ;;  %v3632_v11 = vpop.eup %3631  ;;  %v4334_v20 = vadd.f32 %v991_v14, %v4271_v46  ;;  %3645 = vtanh.f32 %v4329_v16  ;;  %v1046_v2 = vmul.f32 1.442695, %v1020_v61  ;;  %v1023_v3 = vsub.f32 0.0, %v4329_v16 }
 0x2b5   : > { %v3481_v18 = vpop.f32.mrf.mxu0 }
 0x2b6   : > { %3647 = vtanh.f32 %v4334_v20  ;;  %v4340_v22 = vadd.f32 %v3481_v18, %v4271_v46  ;;  %v1022_v8 = vsub.f32 0.0, %v4334_v20  ;;  %v1052_v9 = vmul.f32 1.442695, %v1023_v3 }
 0x2b7   : > { %v3634_v13 = vpop.eup %3633  ;;  %v1001_v21 = vpop.f32.mrf.mxu0 }
 0x2b8   : > { %1132 = vrot.lane.b32.xlu1 %v3632_v11, %s4078_s13  ;;  %1134 = vrot.lane.b32.xlu0 %v3634_v13, %s4078_s13  ;;  %v3636_v15 = vpop.eup %3635  ;;  %v4343_v24 = vadd.f32 %v1001_v21, %v4271_v46  ;;  %3649 = vtanh.f32 %v4340_v22  ;;  %v1036_v46 = vmul.f32 1.442695, %v1015_v39  ;;  %v1050_v14 = vmul.f32 1.442695, %v1022_v8 }
 0x2ba   : > { %3651 = vtanh.f32 %v4343_v24  ;;  %v1024_v20 = vsub.f32 0.0, %v4343_v24 }
 0x2bb   : > { %v3638_v17 = vpop.eup %3637  ;;  %3653 = vpow2.f32 %v1026_v32 }
 0x2bc   : > { %1136 = vrot.lane.b32.xlu1 %v3636_v15, %s4078_s13  ;;  %1138 = vrot.lane.b32.xlu0 %v3638_v17, %s4078_s13  ;;  %v3640_v19 = vpop.eup %3639  ;;  %3655 = vpow2.f32 %v1028_v34  ;;  %v1025_v15 = vsub.f32 0.0, %v4340_v22 }
 0x2bd   : > { %v3642_v23 = vpop.eup %3641  ;;  %3657 = vpow2.f32 %v1030_v36 }
 0x2be   : > { %3659 = vpow2.f32 %v1032_v38 }
 0x2bf   : > { %v3644_v25 = vpop.eup %3643  ;;  %3661 = vpow2.f32 %v1034_v40 }
 0x2c0   : > { %1140 = vrot.lane.b32.xlu1 %v3640_v19, %s4078_s13  ;;  %1142 = vrot.lane.b32.xlu0 %v3644_v25, %s4078_s13  ;;  %3663 = vpow2.f32 %v1036_v46 }
 0x2c1   : > { %v3646_v26 = vpop.eup %3645  ;;  %3665 = vpow2.f32 %v1038_v47 }
 0x2c2   : > { %3667 = vpow2.f32 %v1040_v49 }
 0x2c3   : > { %v3648_v27 = vpop.eup %3647  ;;  %3669 = vpow2.f32 %v1042_v52 }
 0x2c4   : > { %1144 = vrot.lane.b32.xlu1 %v3642_v23, %s4078_s13  ;;  %1146 = vrot.lane.b32.xlu0 %v3648_v27, %s4078_s13  ;;  %3671 = vpow2.f32 %v1044_v53  ;;  %v1056_v23 = vmul.f32 1.442695, %v1025_v15 }
 0x2c5   : > { %v3650_v28 = vpop.eup %3649 }
 0x2c7   : > { %v3652_v29 = vpop.eup %3651 }
 0x2c8   : > { %1148 = vrot.lane.b32.xlu1 %v3646_v26, %s4078_s13  ;;  %1150 = vrot.lane.b32.xlu0 %v3652_v29, %s4078_s13  ;;  %v3654_v51 = vpop.eup %3653 }
 0x2c9   : > { %v3656_v54 = vpop.eup %3655  ;;  %v1058_v55 = vadd.f32 1.0, %v3654_v51 }
 0x2ca   : > { %v3658_v57 = vpop.eup %3657  ;;  %v1059_v58 = vadd.f32 1.0, %v3656_v54 }
 0x2cb   : > { %v3660_v59 = vpop.eup %3659  ;;  %3673 = vrcp.f32 %v1058_v55  ;;  %v1060_v62 = vadd.f32 1.0, %v3658_v57 }
 0x2cc   : > { %1152 = vrot.lane.b32.xlu1 %v3650_v28, %s4078_s13  ;;  %v3662_v63 = vpop.eup %3661  ;;  %3675 = vrcp.f32 %v1059_v58  ;;  %v1061_v0 = vadd.f32 1.0, %v3660_v59  ;;  %v1054_v28 = vmul.f32 1.442695, %v1024_v20 }
 0x2cd   : > { %v3664_v1 = vpop.eup %3663  ;;  %3677 = vpow2.f32 %v1048_v60  ;;  %v1062_v4 = vadd.f32 1.0, %v3662_v63 }
 0x2ce   : > { %3679 = vrcp.f32 %v1060_v62  ;;  %v3666_v5 = vpop.eup %3665  ;;  %v1063_v7 = vadd.f32 1.0, %v3664_v1 }
 0x2cf   : > { %v3668_v6 = vpop.eup %3667  ;;  %3681 = vrcp.f32 %v1061_v0  ;;  %v1064_v10 = vadd.f32 1.0, %v3666_v5 }
 0x2d0   : > { %3683 = vpow2.f32 %v1046_v2  ;;  %v3670_v11 = vpop.eup %3669  ;;  %v1065_v12 = vadd.f32 1.0, %v3668_v6 }
 0x2d1   : > { %3685 = vrcp.f32 %v1062_v4  ;;  %v3672_v13 = vpop.eup %3671  ;;  %v1066_v17 = vadd.f32 1.0, %v3670_v11 }
 0x2d2   : > { %3687 = vrcp.f32 %v1063_v7  ;;  %v1067_v19 = vadd.f32 1.0, %v3672_v13 }
 0x2d3   : > { %3689 = vpow2.f32 %v1052_v9 }
 0x2d4   : > { %3691 = vrcp.f32 %v1064_v10 }
 0x2d5   : > { %3693 = vrcp.f32 %v1065_v12 }
 0x2d6   : > { %3695 = vpow2.f32 %v1050_v14 }
 0x2d8   : > { %v4368_v16 = vpop.eup %3673 }
 0x2d9   : > { %v4372_v25 = vpop.eup %3675 }
 0x2da   : > { %v3678_v26 = vpop.eup %3677 }
 0x2db   : > { %v4374_v27 = vpop.eup %3679  ;;  %v1069_v32 = vadd.f32 1.0, %v3678_v26 }
 0x2dc   : > { %v4378_v31 = vpop.eup %3681 }
 0x2dd   : > { %v3684_v33 = vpop.eup %3683 }
 0x2de   : > { %v4380_v34 = vpop.eup %3685  ;;  %v1068_v40 = vadd.f32 1.0, %v3684_v33 }
 0x2df   : > { %v4384_v39 = vpop.eup %3687 }
 0x2e0   : > { %v3690_v41 = vpop.eup %3689 }
 0x2e1   : > { %v4386_v45 = vpop.eup %3691  ;;  %v1071_v52 = vadd.f32 1.0, %v3690_v41  ;;  %v3136_v41 = vld [vmem:[%s5228_s4 + $0x28] sm:$0xff] }
 0x2e2   : > { %v4388_v48 = vpop.eup %3693 }
 0x2e3   : > { %v3696_v51 = vpop.eup %3695 }
 0x2e4   : > { %v1070_v61 = vadd.f32 1.0, %v3696_v51 }
 0x31e   : > { %v1123_v18 = vpop.permute.xlu0 %1122 }
 0x31f   : > { %v1170_v21 = vmul.f32 %v4368_v16, %v1123_v18 }
 0x321   : > { %3697 = vtanh.f32 %v1170_v21 }
 0x322   : > { %3699 = vrcp.f32 %v1066_v17  ;;  %v1125_v22 = vpop.permute.xlu0 %1124  ;;  %v1127_v29 = vpop.permute.xlu1 %1126 }
 0x323   : > { %3701 = vrcp.f32 %v1067_v19  ;;  %v1171_v30 = vmul.f32 %v4372_v25, %v1125_v22  ;;  %v1172_v24 = vmul.f32 %v4374_v27, %v1127_v29 }
 0x324   : > { %3703 = vpow2.f32 %v1056_v23 }
 0x325   : > { %3705 = vtanh.f32 %v1171_v30 }
 0x326   : > { %3707 = vtanh.f32 %v1172_v24  ;;  %v1129_v35 = vpop.permute.xlu1 %1128  ;;  %v1131_v36 = vpop.permute.xlu0 %1130 }
 0x327   : > { %3709 = vpow2.f32 %v1054_v28  ;;  %v1173_v37 = vmul.f32 %v4378_v31, %v1129_v35  ;;  %v1174_v38 = vmul.f32 %v4380_v34, %v1131_v36 }
 0x328   : > { %3711 = vrcp.f32 %v1069_v32 }
 0x329   : > { %3713 = vtanh.f32 %v1173_v37  ;;  %v3138_v37 = vld [vmem:[%s5228_s4 + $0x38] sm:$0xff] }
 0x32a   : > { %3715 = vtanh.f32 %v1174_v38  ;;  %v1133_v46 = vpop.permute.xlu1 %1132  ;;  %v1135_v47 = vpop.permute.xlu0 %1134  ;;  %v3137_v38 = vld [vmem:[%s5228_s4 + $0x30] sm:$0xff]  ;;  %3482 = vmatprep.subr.mxu1 %v3138_v37 }
 0x32b   : > { %v1175_v49 = vmul.f32 %v4384_v39, %v1133_v46  ;;  %v1176_v50 = vmul.f32 %v4386_v45, %v1135_v47  ;;  %3717 = vrcp.f32 %v1068_v40  ;;  %3483 = vmatpush3.msra.mxu1 %v3138_v37  ;;  %v3135_v47 = vld [vmem:[%s5228_s4 + $0x20] sm:$0xff] }
 0x32c   : > { %3484 = vmatprep.subr.mxu1 %v3137_v38 }
 0x32d   : > { %3719 = vtanh.f32 %v1175_v49  ;;  %3485 = vmatpush3.msra.mxu1 %v3137_v38 }
 0x32e   : > { %v3698_v53 = vpop.eup %3697  ;;  %3721 = vtanh.f32 %v1176_v50  ;;  %v1137_v55 = vpop.permute.xlu1 %1136  ;;  %3486 = vmatprep.subr.mxu1 %v3136_v41 }
 0x32f   : > { %v4392_v54 = vpop.eup %3699  ;;  %v1139_v56 = vpop.permute.xlu0 %1138  ;;  %1218 = vrot.lane.b32.xlu0 %v3698_v53, %s4079_s14  ;;  %v1177_v58 = vmul.f32 %v4388_v48, %v1137_v55  ;;  %3723 = vrcp.f32 %v1071_v52  ;;  %3487 = vmatpush3.msra.mxu1 %v3136_v41 }
 0x330   : > { %v4395_v57 = vpop.eup %3701  ;;  %v1178_v59 = vmul.f32 %v4392_v54, %v1139_v56  ;;  %3488 = vmatprep.subr.mxu1 %v3135_v47 }
 0x331   : > { %v3704_v60 = vpop.eup %3703  ;;  %3725 = vtanh.f32 %v1177_v58  ;;  %3489 = vmatpush3.msra.mxu1 %v3135_v47 }
 0x332   : > { %v3706_v62 = vpop.eup %3705  ;;  %3727 = vtanh.f32 %v1178_v59  ;;  %v1141_v0 = vpop.permute.xlu1 %1140  ;;  %v1073_v3 = vadd.f32 1.0, %v3704_v60 }
 0x333   : > { %v3708_v63 = vpop.eup %3707  ;;  %1220 = vrot.lane.b32.xlu1 %v3706_v62, %s4079_s14  ;;  %v1179_v2 = vmul.f32 %v4395_v57, %v1141_v0  ;;  %3729 = vrcp.f32 %v1070_v61  ;;  %v1143_v12 = vpop.permute.xlu0 %1142 }
 0x334   : > { %v3710_v1 = vpop.eup %3709  ;;  %1222 = vrot.lane.b32.xlu0 %v3708_v63, %s4079_s14 }
 0x335   : > { %v4402_v4 = vpop.eup %3711  ;;  %3731 = vtanh.f32 %v1179_v2  ;;  %v1072_v6 = vadd.f32 1.0, %v3710_v1 }
 0x336   : > { %v3714_v5 = vpop.eup %3713  ;;  %v1145_v7 = vpop.permute.xlu1 %1144  ;;  %3733 = vrcp.f32 %v1073_v3 }
 0x337   : > { %v3716_v8 = vpop.eup %3715  ;;  %v1181_v9 = vmul.f32 %v4402_v4, %v1145_v7  ;;  %1224 = vrot.lane.b32.xlu1 %v3714_v5, %s4079_s14  ;;  %v1147_v23 = vpop.permute.xlu0 %1146 }
 0x338   : > { %1226 = vrot.lane.b32.xlu0 %v3716_v8, %s4079_s14  ;;  %v4407_v10 = vpop.eup %3717 }
 0x339   : > { %3735 = vtanh.f32 %v1181_v9  ;;  %v1180_v14 = vmul.f32 %v4407_v10, %v1143_v12 }
 0x33a   : > { %v3720_v11 = vpop.eup %3719  ;;  %3737 = vrcp.f32 %v1072_v6  ;;  %v1149_v18 = vpop.permute.xlu1 %1148 }
 0x33b   : > { %v3722_v13 = vpop.eup %3721  ;;  %1228 = vrot.lane.b32.xlu1 %v3720_v11, %s4079_s14  ;;  %3739 = vtanh.f32 %v1180_v14  ;;  %v1151_v33 = vpop.permute.xlu0 %1150 }
 0x33c   : > { %1230 = vrot.lane.b32.xlu0 %v3722_v13, %s4079_s14  ;;  %v4412_v15 = vpop.eup %3723 }
 0x33d   : > { %v1183_v20 = vmul.f32 %v4412_v15, %v1149_v18 }
 0x33e   : > { %v3726_v17 = vpop.eup %3725  ;;  %v1153_v29 = vpop.permute.xlu1 %1152 }
 0x33f   : > { %v3728_v19 = vpop.eup %3727  ;;  %1232 = vrot.lane.b32.xlu1 %v3726_v17, %s4079_s14  ;;  %3741 = vtanh.f32 %v1183_v20 }
 0x340   : > { %1234 = vrot.lane.b32.xlu0 %v3728_v19, %s4079_s14  ;;  %v4417_v21 = vpop.eup %3729 }
 0x341   : > { %v1182_v22 = vmul.f32 %v4417_v21, %v1147_v23 }
 0x342   : > { %v3732_v26 = vpop.eup %3731 }
 0x343   : > { %1236 = vrot.lane.b32.xlu1 %v3732_v26, %s4079_s14  ;;  %3743 = vtanh.f32 %v1182_v22  ;;  %v4421_v28 = vpop.eup %3733 }
 0x344   : > { %v1185_v24 = vmul.f32 %v4421_v28, %v1153_v29 }
 0x346   : > { %v3736_v30 = vpop.eup %3735  ;;  %3745 = vtanh.f32 %v1185_v24  ;;  %v1289_v24 = vsub.s32 1, %v4260_v42 }
 0x347   : > { %v4424_v32 = vpop.eup %3737  ;;  %1240 = vrot.lane.b32.xlu1 %v3736_v30, %s4079_s14 }
 0x348   : > { %v1184_v35 = vmul.f32 %v4424_v32, %v1151_v33  ;;  %v3740_v36 = vpop.eup %3739 }
 0x349   : > { %1238 = vrot.lane.b32.xlu0 %v3740_v36, %s4079_s14 }
 0x34a   : > { %3747 = vtanh.f32 %v1184_v35 }
 0x34c   : > { %v3742_v40 = vpop.eup %3741 }
 0x34d   : > { %1244 = vrot.lane.b32.xlu1 %v3742_v40, %s4079_s14 }
 0x350   : > { %v3744_v46 = vpop.eup %3743 }
 0x351   : > { %1242 = vrot.lane.b32.xlu0 %v3744_v46, %s4079_s14 }
 0x353   : > { %v3746_v49 = vpop.eup %3745 }
 0x354   : > { %1248 = vrot.lane.b32.xlu1 %v3746_v49, %s4079_s14 }
 0x357   : > { %v3748_v50 = vpop.eup %3747 }
 0x358   : > { %1246 = vrot.lane.b32.xlu0 %v3748_v50, %s4079_s14 }
 0x3a1   : > { %v1219_v51 = vpop.permute.xlu0 %1218 }
 0x3a2   : > { %v1266_v52 = vmul.f32 %v4368_v16, %v1219_v51 }
 0x3a4   : > { %1307 = vrot.lane.b32.xlu0 %v1266_v52, %s4080_s25 }
 0x3a5   : > { %v1221_v53 = vpop.permute.xlu1 %1220 }
 0x3a6   : > { %v1267_v55 = vmul.f32 %v4372_v25, %v1221_v53  ;;  %v1223_v56 = vpop.permute.xlu0 %1222 }
 0x3a7   : > { %v1268_v58 = vmul.f32 %v4374_v27, %v1223_v56 }
 0x3a8   : > { %1309 = vrot.lane.b32.xlu1 %v1267_v55, %s4080_s25 }
 0x3a9   : > { %1311 = vrot.lane.b32.xlu0 %v1268_v58, %s4080_s25  ;;  %v1225_v59 = vpop.permute.xlu1 %1224 }
 0x3aa   : > { %v1269_v60 = vmul.f32 %v4378_v31, %v1225_v59  ;;  %v1227_v61 = vpop.permute.xlu0 %1226 }
 0x3ab   : > { %v1270_v62 = vmul.f32 %v4380_v34, %v1227_v61 }
 0x3ac   : > { %1313 = vrot.lane.b32.xlu1 %v1269_v60, %s4080_s25 }
 0x3ad   : > { %1315 = vrot.lane.b32.xlu0 %v1270_v62, %s4080_s25  ;;  %v1229_v16 = vpop.permute.xlu1 %1228 }
 0x3ae   : > { %v1271_v25 = vmul.f32 %v4384_v39, %v1229_v16  ;;  %v1231_v63 = vpop.permute.xlu0 %1230 }
 0x3af   : > { %v1272_v27 = vmul.f32 %v4386_v45, %v1231_v63 }
 0x3b0   : > { %1317 = vrot.lane.b32.xlu1 %v1271_v25, %s4080_s25 }
 0x3b1   : > { %1319 = vrot.lane.b32.xlu0 %v1272_v27, %s4080_s25  ;;  %v1233_v0 = vpop.permute.xlu1 %1232 }
 0x3b2   : > { %v1273_v31 = vmul.f32 %v4388_v48, %v1233_v0  ;;  %v1235_v1 = vpop.permute.xlu0 %1234 }
 0x3b3   : > { %v1274_v34 = vmul.f32 %v4392_v54, %v1235_v1 }
 0x3b4   : > { %1321 = vrot.lane.b32.xlu1 %v1273_v31, %s4080_s25 }
 0x3b5   : > { %1323 = vrot.lane.b32.xlu0 %v1274_v34, %s4080_s25  ;;  %v1237_v2 = vpop.permute.xlu1 %1236 }
 0x3b6   : > { %v1275_v39 = vmul.f32 %v4395_v57, %v1237_v2 }
 0x3b8   : > { %1325 = vrot.lane.b32.xlu1 %v1275_v39, %s4080_s25 }
 0x3b9   : > { %v1241_v45 = vpop.permute.xlu1 %1240 }
 0x3ba   : > { %v1277_v3 = vmul.f32 %v4402_v4, %v1241_v45 }
 0x3bb   : > { %v1239_v5 = vpop.permute.xlu0 %1238 }
 0x3bc   : > { %1329 = vrot.lane.b32.xlu1 %v1277_v3, %s4080_s25  ;;  %v1276_v48 = vmul.f32 %v4407_v10, %v1239_v5 }
 0x3be   : > { %1327 = vrot.lane.b32.xlu0 %v1276_v48, %s4080_s25 }
 0x3bf   : > { %v1245_v54 = vpop.permute.xlu1 %1244 }
 0x3c0   : > { %v1279_v6 = vmul.f32 %v4412_v15, %v1245_v54 }
 0x3c2   : > { %1333 = vrot.lane.b32.xlu1 %v1279_v6, %s4080_s25 }
 0x3c3   : > { %v1243_v7 = vpop.permute.xlu0 %1242 }
 0x3c4   : > { %v1278_v57 = vmul.f32 %v4417_v21, %v1243_v7 }
 0x3c6   : > { %1331 = vrot.lane.b32.xlu0 %v1278_v57, %s4080_s25  ;;  %v1249_v8 = vpop.permute.xlu1 %1248 }
 0x3c7   : > { %v1281_v4 = vmul.f32 %v4421_v28, %v1249_v8 }
 0x3c9   : > { %1337 = vrot.lane.b32.xlu1 %v1281_v4, %s4080_s25 }
 0x3ca   : > { %v1247_v9 = vpop.permute.xlu0 %1246 }
 0x3cb   : > { %v1280_v11 = vmul.f32 %v4424_v32, %v1247_v9  ;;  %v4497_v32 = vrot.slane %v4266_v44, %v1289_v24 }
 0x3cd   : > { %1335 = vrot.lane.b32.xlu0 %v1280_v11, %s4080_s25 }
 0x416   : > { %v1308_v10 = vpop.permute.xlu0 %1307 }
 0x417   : > { %3490 = vmatprep.mubr.msk.f32.mxu1 %vm446_vm0, %v1308_v10 }
 0x41a   : > { %v1310_v12 = vpop.permute.xlu1 %1309 }
 0x41b   : > { %v1312_v13 = vpop.permute.xlu0 %1311  ;;  %3491 = vmatmul.mubr.msk.f32.vlgmr.msra.gmra.mxu1 %vm446_vm0, %v1310_v12 }
 0x41c   : > { %3493 = vmatprep.mubr.msk.f32.mxu1 %vm446_vm0, %v1312_v13 }
 0x41e   : > { %v1314_v14 = vpop.permute.xlu1 %1313 }
 0x41f   : > { %v1316_v15 = vpop.permute.xlu0 %1315  ;;  %3494 = vmatmul.mubr.msk.f32.gmra.mxu1 %vm446_vm0, %v1314_v14 }
 0x420   : > { %3496 = vmatprep.mubr.msk.f32.mxu1 %vm446_vm0, %v1316_v15 }
 0x422   : > { %v1318_v17 = vpop.permute.xlu1 %1317 }
 0x423   : > { %v1320_v18 = vpop.permute.xlu0 %1319  ;;  %3497 = vmatmul.mubr.msk.f32.gmra.mxu1 %vm446_vm0, %v1318_v17 }
 0x424   : > { %3499 = vmatprep.mubr.msk.f32.mxu1 %vm446_vm0, %v1320_v18 }
 0x426   : > { %v1322_v19 = vpop.permute.xlu1 %1321 }
 0x427   : > { %v1324_v20 = vpop.permute.xlu0 %1323  ;;  %3500 = vmatmul.mubr.msk.f32.gmra.mxu1 %vm446_vm0, %v1322_v19 }
 0x428   : > { %3502 = vmatprep.mubr.msk.f32.mxu1 %vm446_vm0, %v1324_v20 }
 0x42a   : > { %v1326_v21 = vpop.permute.xlu1 %1325 }
 0x42b   : > { %3503 = vmatmul.mubr.msk.f32.gmra.mxu1 %vm446_vm0, %v1326_v21 }
 0x42e   : > { %v1330_v23 = vpop.permute.xlu1 %1329 }
 0x430   : > { %v1328_v26 = vpop.permute.xlu0 %1327 }
 0x431   : > { %3505 = vmatprep.mubr.msk.f32.mxu1 %vm446_vm0, %v1328_v26 }
 0x432   : > { %3506 = vmatmul.mubr.msk.f32.gmra.mxu1 %vm446_vm0, %v1330_v23 }
 0x434   : > { %v1334_v22 = vpop.permute.xlu1 %1333 }
 0x438   : > { %v1332_v28 = vpop.permute.xlu0 %1331 }
 0x439   : > { %3508 = vmatprep.mubr.msk.f32.mxu1 %vm446_vm0, %v1332_v28 }
 0x43a   : > { %3509 = vmatmul.mubr.msk.f32.gmra.mxu1 %vm446_vm0, %v1334_v22 }
 0x43b   : > { %v1338_v29 = vpop.permute.xlu1 %1337 }
 0x43f   : > { %v1336_v30 = vpop.permute.xlu0 %1335 }
 0x440   : > { %3511 = vmatprep.mubr.msk.f32.mxu1 %vm446_vm0, %v1336_v30 }
 0x441   : > { %3512 = vmatmul.mubr.msk.f32.gmra.mxu1 %vm446_vm0, %v1338_v29 }
 0x4db   : > { %v3492_v33 = vpop.f32.mrf.mxu1 }
 0x4dc   : > { %v4500_v35 = vadd.f32 %v3492_v33, %v4497_v32 }
 0x4dd   : > { %v1437_v36 = vpop.f32.mrf.mxu1 }
 0x4de   : > { %3749 = vtanh.f32 %v4500_v35  ;;  %v4504_v37 = vadd.f32 %v1437_v36, %v4497_v32  ;;  %v1517_v15 = vsub.f32 0.0, %v4500_v35 }
 0x4df   : > { %v3495_v38 = vpop.f32.mrf.mxu1 }
 0x4e0   : > { %3751 = vtanh.f32 %v4504_v37  ;;  %v4508_v40 = vadd.f32 %v3495_v38, %v4497_v32  ;;  %v1516_v17 = vsub.f32 0.0, %v4504_v37  ;;  %v1534_v18 = vmul.f32 1.442695, %v1517_v15 }
 0x4e1   : > { %v1447_v41 = vpop.f32.mrf.mxu1 }
 0x4e2   : > { %3753 = vtanh.f32 %v4508_v40  ;;  %v4512_v44 = vadd.f32 %v1447_v41, %v4497_v32  ;;  %v1519_v19 = vsub.f32 0.0, %v4508_v40  ;;  %v1532_v20 = vmul.f32 1.442695, %v1516_v17 }
 0x4e3   : > { %v3498_v46 = vpop.f32.mrf.mxu1 }
 0x4e4   : > { %3755 = vtanh.f32 %v4512_v44  ;;  %v4516_v47 = vadd.f32 %v3498_v46, %v4497_v32  ;;  %v1518_v21 = vsub.f32 0.0, %v4512_v44  ;;  %v1538_v23 = vmul.f32 1.442695, %v1519_v19 }
 0x4e5   : > { %v1457_v49 = vpop.f32.mrf.mxu1 }
 0x4e6   : > { %v4519_v50 = vadd.f32 %v1457_v49, %v4497_v32  ;;  %3757 = vtanh.f32 %v4516_v47  ;;  %v1536_v26 = vmul.f32 1.442695, %v1518_v21  ;;  %v1521_v22 = vsub.f32 0.0, %v4516_v47 }
 0x4e7   : > { %v3501_v51 = vpop.f32.mrf.mxu1 }
 0x4e8   : > { %v4523_v52 = vadd.f32 %v3501_v51, %v4497_v32  ;;  %3759 = vtanh.f32 %v4519_v50  ;;  %v1520_v28 = vsub.f32 0.0, %v4519_v50  ;;  %v1542_v30 = vmul.f32 1.442695, %v1521_v22 }
 0x4e9   : > { %v1467_v53 = vpop.f32.mrf.mxu1 }
 0x4ea   : > { %v4527_v56 = vadd.f32 %v1467_v53, %v4497_v32  ;;  %3761 = vtanh.f32 %v4523_v52  ;;  %v1523_v29 = vsub.f32 0.0, %v4523_v52  ;;  %v1540_v33 = vmul.f32 1.442695, %v1520_v28 }
 0x4eb   : > { %v3750_v55 = vpop.eup %3749  ;;  %v3504_v58 = vpop.f32.mrf.mxu1 }
 0x4ec   : > { %1630 = vrot.lane.b32.xlu1 %v3750_v55, %s4078_s13  ;;  %v4532_v60 = vadd.f32 %v3504_v58, %v4497_v32  ;;  %3763 = vtanh.f32 %v4527_v56  ;;  %v1546_v35 = vmul.f32 1.442695, %v1523_v29 }
 0x4ed   : > { %v3752_v59 = vpop.eup %3751  ;;  %v1477_v61 = vpop.f32.mrf.mxu1 }
 0x4ee   : > { %1628 = vrot.lane.b32.xlu0 %v3752_v59, %s4078_s13  ;;  %3765 = vtanh.f32 %v4532_v60  ;;  %v4539_v25 = vadd.f32 %v1477_v61, %v4497_v32  ;;  %v1525_v36 = vsub.f32 0.0, %v4532_v60 }
 0x4ef   : > { %v3754_v62 = vpop.eup %3753 }
 0x4f0   : > { %1634 = vrot.lane.b32.xlu1 %v3754_v62, %s4078_s13  ;;  %3767 = vtanh.f32 %v4539_v25  ;;  %v1550_v40 = vmul.f32 1.442695, %v1525_v36  ;;  %v1524_v44 = vsub.f32 0.0, %v4539_v25 }
 0x4f1   : > { %v3756_v16 = vpop.eup %3755 }
 0x4f2   : > { %1632 = vrot.lane.b32.xlu0 %v3756_v16, %s4078_s13  ;;  %v3507_v27 = vpop.f32.mrf.mxu1  ;;  %v1548_v52 = vmul.f32 1.442695, %v1524_v44 }
 0x4f3   : > { %v3758_v63 = vpop.eup %3757  ;;  %v4544_v0 = vadd.f32 %v3507_v27, %v4497_v32 }
 0x4f4   : > { %1638 = vrot.lane.b32.xlu1 %v3758_v63, %s4078_s13  ;;  %v1487_v1 = vpop.f32.mrf.mxu1 }
 0x4f5   : > { %v3760_v31 = vpop.eup %3759  ;;  %3769 = vtanh.f32 %v4544_v0  ;;  %v4549_v34 = vadd.f32 %v1487_v1, %v4497_v32  ;;  %v1527_v49 = vsub.f32 0.0, %v4544_v0 }
 0x4f6   : > { %1636 = vrot.lane.b32.xlu0 %v3760_v31, %s4078_s13 }
 0x4f7   : > { %v3762_v2 = vpop.eup %3761  ;;  %3771 = vtanh.f32 %v4549_v34  ;;  %v1526_v53 = vsub.f32 0.0, %v4549_v34 }
 0x4f8   : > { %1642 = vrot.lane.b32.xlu1 %v3762_v2, %s4078_s13 }
 0x4f9   : > { %v3764_v39 = vpop.eup %3763  ;;  %v1552_v60 = vmul.f32 1.442695, %v1526_v53 }
 0x4fa   : > { %v3510_v45 = vpop.f32.mrf.mxu1  ;;  %1640 = vrot.lane.b32.xlu0 %v3764_v39, %s4078_s13 }
 0x4fb   : > { %v3766_v3 = vpop.eup %3765  ;;  %v4556_v5 = vadd.f32 %v3510_v45, %v4497_v32 }
 0x4fc   : > { %v1497_v48 = vpop.f32.mrf.mxu1  ;;  %1646 = vrot.lane.b32.xlu1 %v3766_v3, %s4078_s13 }
 0x4fd   : > { %v4560_v54 = vadd.f32 %v1497_v48, %v4497_v32  ;;  %3773 = vtanh.f32 %v4556_v5  ;;  %v3768_v7 = vpop.eup %3767  ;;  %v1529_v16 = vsub.f32 0.0, %v4556_v5 }
 0x4fe   : > { %1644 = vrot.lane.b32.xlu0 %v3768_v7, %s4078_s13 }
 0x4ff   : > { %3775 = vtanh.f32 %v4560_v54  ;;  %v1528_v0 = vsub.f32 0.0, %v4560_v54  ;;  %v1558_v1 = vmul.f32 1.442695, %v1529_v16 }
 0x501   : > { %v3513_v6 = vpop.f32.mrf.mxu1  ;;  %v1556_v39 = vmul.f32 1.442695, %v1528_v0 }
 0x502   : > { %v4565_v57 = vadd.f32 %v3513_v6, %v4497_v32  ;;  %v3770_v4 = vpop.eup %3769 }
 0x503   : > { %v1507_v8 = vpop.f32.mrf.mxu1  ;;  %1650 = vrot.lane.b32.xlu1 %v3770_v4, %s4078_s13 }
 0x504   : > { %v4569_v9 = vadd.f32 %v1507_v8, %v4497_v32  ;;  %v3772_v11 = vpop.eup %3771  ;;  %3777 = vtanh.f32 %v4565_v57  ;;  %v1522_v32 = vsub.f32 0.0, %v4527_v56  ;;  %v1554_v56 = vmul.f32 1.442695, %v1527_v49 }
 0x505   : > { %1648 = vrot.lane.b32.xlu0 %v3772_v11, %s4078_s13  ;;  %v1531_v45 = vsub.f32 0.0, %v4565_v57 }
 0x506   : > { %3779 = vtanh.f32 %v4569_v9  ;;  %v1544_v37 = vmul.f32 1.442695, %v1522_v32  ;;  %v1530_v3 = vsub.f32 0.0, %v4569_v9 }
 0x507   : > { %3781 = vpow2.f32 %v1534_v18  ;;  %v1562_v8 = vmul.f32 1.442695, %v1531_v45 }
 0x508   : > { %3783 = vpow2.f32 %v1532_v20 }
 0x509   : > { %3785 = vpow2.f32 %v1538_v23 }
 0x50a   : > { %v3774_v10 = vpop.eup %3773  ;;  %3787 = vpow2.f32 %v1536_v26 }
 0x50b   : > { %1654 = vrot.lane.b32.xlu1 %v3774_v10, %s4078_s13  ;;  %3789 = vpow2.f32 %v1542_v30  ;;  %v1560_v10 = vmul.f32 1.442695, %v1530_v3 }
 0x50c   : > { %v3776_v12 = vpop.eup %3775  ;;  %3791 = vpow2.f32 %v1540_v33 }
 0x50d   : > { %1652 = vrot.lane.b32.xlu0 %v3776_v12, %s4078_s13  ;;  %3793 = vpow2.f32 %v1546_v35 }
 0x50e   : > { %3795 = vpow2.f32 %v1544_v37 }
 0x50f   : > { %3797 = vpow2.f32 %v1550_v40 }
 0x511   : > { %v3778_v13 = vpop.eup %3777 }
 0x512   : > { %1658 = vrot.lane.b32.xlu1 %v3778_v13, %s4078_s13 }
 0x513   : > { %v3780_v14 = vpop.eup %3779 }
 0x514   : > { %1656 = vrot.lane.b32.xlu0 %v3780_v14, %s4078_s13  ;;  %v3782_v38 = vpop.eup %3781 }
 0x515   : > { %v3784_v41 = vpop.eup %3783  ;;  %v1565_v46 = vadd.f32 1.0, %v3782_v38 }
 0x516   : > { %v3786_v47 = vpop.eup %3785  ;;  %v1564_v50 = vadd.f32 1.0, %v3784_v41 }
 0x517   : > { %v3788_v51 = vpop.eup %3787  ;;  %3799 = vrcp.f32 %v1565_v46  ;;  %v1567_v55 = vadd.f32 1.0, %v3786_v47 }
 0x518   : > { %3801 = vrcp.f32 %v1564_v50  ;;  %v1566_v58 = vadd.f32 1.0, %v3788_v51  ;;  %v3790_v59 = vpop.eup %3789 }
 0x519   : > { %3803 = vpow2.f32 %v1548_v52  ;;  %v3792_v61 = vpop.eup %3791  ;;  %v1569_v25 = vadd.f32 1.0, %v3790_v59 }
 0x51a   : > { %3805 = vrcp.f32 %v1567_v55  ;;  %v3794_v62 = vpop.eup %3793  ;;  %v1568_v27 = vadd.f32 1.0, %v3792_v61 }
 0x51b   : > { %3807 = vpow2.f32 %v1554_v56  ;;  %v3796_v63 = vpop.eup %3795  ;;  %v1571_v31 = vadd.f32 1.0, %v3794_v62 }
 0x51c   : > { %3809 = vrcp.f32 %v1566_v58  ;;  %v3798_v34 = vpop.eup %3797  ;;  %v1570_v2 = vadd.f32 1.0, %v3796_v63 }
 0x51d   : > { %3811 = vpow2.f32 %v1552_v60  ;;  %v1573_v48 = vadd.f32 1.0, %v3798_v34 }
 0x51e   : > { %3813 = vrcp.f32 %v1569_v25 }
 0x51f   : > { %3815 = vrcp.f32 %v1568_v27 }
 0x520   : > { %3817 = vrcp.f32 %v1571_v31 }
 0x521   : > { %3819 = vpow2.f32 %v1558_v1 }
 0x522   : > { %3821 = vrcp.f32 %v1570_v2 }
 0x523   : > { %3823 = vpow2.f32 %v1556_v39 }
 0x524   : > { %v4595_v5 = vpop.eup %3799 }
 0x525   : > { %v4598_v7 = vpop.eup %3801 }
 0x526   : > { %v3804_v11 = vpop.eup %3803 }
 0x527   : > { %v4601_v12 = vpop.eup %3805  ;;  %v1572_v18 = vadd.f32 1.0, %v3804_v11 }
 0x528   : > { %v3808_v9 = vpop.eup %3807 }
 0x529   : > { %v4603_v14 = vpop.eup %3809  ;;  %v1575_v20 = vadd.f32 1.0, %v3808_v9 }
 0x52a   : > { %v3812_v17 = vpop.eup %3811 }
 0x52b   : > { %v4607_v23 = vpop.eup %3813  ;;  %v1574_v26 = vadd.f32 1.0, %v3812_v17 }
 0x52c   : > { %v4609_v28 = vpop.eup %3815 }
 0x52d   : > { %v4612_v30 = vpop.eup %3817 }
 0x52e   : > { %v3820_v33 = vpop.eup %3819 }
 0x52f   : > { %v4615_v36 = vpop.eup %3821  ;;  %v1577_v44 = vadd.f32 1.0, %v3820_v33 }
 0x530   : > { %v3824_v38 = vpop.eup %3823 }
 0x531   : > { %v1576_v53 = vadd.f32 1.0, %v3824_v38 }
 0x55e   : > { %v1631_v6 = vpop.permute.xlu1 %1630 }
 0x55f   : > { %v1677_v54 = vmul.f32 %v4595_v5, %v1631_v6 }
 0x560   : > { %v1629_v4 = vpop.permute.xlu0 %1628 }
 0x561   : > { %3825 = vtanh.f32 %v1677_v54  ;;  %v1676_v57 = vmul.f32 %v4598_v7, %v1629_v4 }
 0x562   : > { %3827 = vrcp.f32 %v1573_v48  ;;  %v1635_v13 = vpop.permute.xlu1 %1634 }
 0x563   : > { %3829 = vtanh.f32 %v1676_v57  ;;  %v1679_v15 = vmul.f32 %v4601_v12, %v1635_v13 }
 0x564   : > { %3831 = vpow2.f32 %v1562_v8  ;;  %v1633_v19 = vpop.permute.xlu0 %1632 }
 0x565   : > { %3833 = vpow2.f32 %v1560_v10  ;;  %v1678_v21 = vmul.f32 %v4603_v14, %v1633_v19 }
 0x566   : > { %3835 = vtanh.f32 %v1679_v15  ;;  %v1639_v22 = vpop.permute.xlu1 %1638 }
 0x567   : > { %3837 = vtanh.f32 %v1678_v21  ;;  %v1681_v29 = vmul.f32 %v4607_v23, %v1639_v22  ;;  %v3157_v22 = vld [vmem:[%s5228_s4 + $0x50] sm:$0xff] }
 0x568   : > { %3839 = vrcp.f32 %v1572_v18  ;;  %v1637_v32 = vpop.permute.xlu0 %1636 }
 0x569   : > { %3841 = vrcp.f32 %v1575_v20  ;;  %v1680_v35 = vmul.f32 %v4609_v28, %v1637_v32  ;;  %v3156_v32 = vld [vmem:[%s5228_s4 + $0x48] sm:$0xff] }
 0x56a   : > { %3843 = vtanh.f32 %v1681_v29  ;;  %v1643_v37 = vpop.permute.xlu1 %1642 }
 0x56b   : > { %3845 = vrcp.f32 %v1574_v26  ;;  %v1683_v40 = vmul.f32 %v4612_v30, %v1643_v37  ;;  %v3158_v26 = vld [vmem:[%s5228_s4 + $0x58] sm:$0xff] }
 0x56c   : > { %3847 = vtanh.f32 %v1680_v35  ;;  %v1641_v46 = vpop.permute.xlu0 %1640  ;;  %3514 = vmatprep.subr.mxu0 %v3158_v26  ;;  %v3155_v35 = vld [vmem:[%s5228_s4 + $0x40] sm:$0xff] }
 0x56d   : > { %3849 = vtanh.f32 %v1683_v40  ;;  %v1682_v49 = vmul.f32 %v4615_v36, %v1641_v46  ;;  %3515 = vmatpush3.msra.mxu0 %v3158_v26 }
 0x56e   : > { %v3826_v41 = vpop.eup %3825  ;;  %v1647_v51 = vpop.permute.xlu1 %1646  ;;  %3516 = vmatprep.subr.mxu0 %v3157_v22 }
 0x56f   : > { %v4618_v47 = vpop.eup %3827  ;;  %1726 = vrot.lane.b32.xlu1 %v3826_v41, %s4079_s14  ;;  %3851 = vtanh.f32 %v1682_v49  ;;  %3517 = vmatpush3.msra.mxu0 %v3157_v22 }
 0x570   : > { %v3830_v50 = vpop.eup %3829  ;;  %v1685_v55 = vmul.f32 %v4618_v47, %v1647_v51  ;;  %3853 = vrcp.f32 %v1577_v44  ;;  %v1645_v16 = vpop.permute.xlu0 %1644  ;;  %3518 = vmatprep.subr.mxu0 %v3156_v32 }
 0x571   : > { %v3832_v52 = vpop.eup %3831  ;;  %1724 = vrot.lane.b32.xlu0 %v3830_v50, %s4079_s14  ;;  %3519 = vmatpush3.msra.mxu0 %v3156_v32 }
 0x572   : > { %v3834_v56 = vpop.eup %3833  ;;  %3855 = vtanh.f32 %v1685_v55  ;;  %v1579_v59 = vadd.f32 1.0, %v3832_v52  ;;  %3520 = vmatprep.subr.mxu0 %v3155_v35 }
 0x573   : > { %v3836_v58 = vpop.eup %3835  ;;  %3857 = vrcp.f32 %v1576_v53  ;;  %v1578_v62 = vadd.f32 1.0, %v3834_v56  ;;  %3521 = vmatpush3.msra.mxu0 %v3155_v35 }
 0x574   : > { %1730 = vrot.lane.b32.xlu1 %v3836_v58, %s4079_s14  ;;  %v3838_v60 = vpop.eup %3837  ;;  %3859 = vrcp.f32 %v1579_v59 }
 0x575   : > { %v4625_v61 = vpop.eup %3839  ;;  %1728 = vrot.lane.b32.xlu0 %v3838_v60, %s4079_s14  ;;  %v1651_v0 = vpop.permute.xlu1 %1650 }
 0x576   : > { %v4628_v25 = vpop.eup %3841  ;;  %v1684_v63 = vmul.f32 %v4625_v61, %v1645_v16 }
 0x577   : > { %v3844_v27 = vpop.eup %3843  ;;  %v1687_v1 = vmul.f32 %v4628_v25, %v1651_v0  ;;  %v1649_v2 = vpop.permute.xlu0 %1648 }
 0x578   : > { %v4631_v31 = vpop.eup %3845  ;;  %3861 = vtanh.f32 %v1684_v63  ;;  %1734 = vrot.lane.b32.xlu1 %v3844_v27, %s4079_s14 }
 0x579   : > { %v3848_v34 = vpop.eup %3847  ;;  %3863 = vrcp.f32 %v1578_v62  ;;  %v1686_v39 = vmul.f32 %v4631_v31, %v1649_v2 }
 0x57a   : > { %3865 = vtanh.f32 %v1687_v1  ;;  %1732 = vrot.lane.b32.xlu0 %v3848_v34, %s4079_s14  ;;  %v3850_v45 = vpop.eup %3849 }
 0x57b   : > { %3867 = vtanh.f32 %v1686_v39 }
 0x57c   : > { %1738 = vrot.lane.b32.xlu1 %v3850_v45, %s4079_s14  ;;  %v3852_v3 = vpop.eup %3851 }
 0x57d   : > { %v4638_v48 = vpop.eup %3853  ;;  %v1655_v54 = vpop.permute.xlu1 %1654 }
 0x57e   : > { %1736 = vrot.lane.b32.xlu0 %v3852_v3, %s4079_s14  ;;  %v1689_v8 = vmul.f32 %v4638_v48, %v1655_v54 }
 0x57f   : > { %v3856_v6 = vpop.eup %3855  ;;  %v1653_v11 = vpop.permute.xlu0 %1652 }
 0x580   : > { %1742 = vrot.lane.b32.xlu1 %v3856_v6, %s4079_s14  ;;  %v4643_v4 = vpop.eup %3857  ;;  %3869 = vtanh.f32 %v1689_v8 }
 0x581   : > { %v1688_v10 = vmul.f32 %v4643_v4, %v1653_v11  ;;  %v4646_v57 = vpop.eup %3859 }
 0x583   : > { %3871 = vtanh.f32 %v1688_v10 }
 0x584   : > { %v1659_v15 = vpop.permute.xlu1 %1658 }
 0x585   : > { %v3862_v9 = vpop.eup %3861  ;;  %v1691_v18 = vmul.f32 %v4646_v57, %v1659_v15 }
 0x586   : > { %v4648_v13 = vpop.eup %3863  ;;  %1740 = vrot.lane.b32.xlu0 %v3862_v9, %s4079_s14  ;;  %v1657_v19 = vpop.permute.xlu0 %1656 }
 0x587   : > { %v3866_v17 = vpop.eup %3865  ;;  %v1690_v20 = vmul.f32 %v4648_v13, %v1657_v19  ;;  %3873 = vtanh.f32 %v1691_v18  ;;  %v4069_v18 = vld [vmem:[%s5229_s5] sm:$0x7] }
 0x588   : > { %1746 = vrot.lane.b32.xlu1 %v3866_v17, %s4079_s14  ;;  %v3868_v21 = vpop.eup %3867  ;;  %v1795_v17 = vsub.s32 2, %v4260_v42 }
 0x589   : > { %3875 = vtanh.f32 %v1690_v20 }
 0x58a   : > { %1744 = vrot.lane.b32.xlu0 %v3868_v21, %s4079_s14  ;;  %v4723_v19 = vrot.slane %v4069_v18, %v1795_v17 }
 0x58d   : > { %v3870_v29 = vpop.eup %3869 }
 0x58e   : > { %1750 = vrot.lane.b32.xlu1 %v3870_v29, %s4079_s14 }
 0x590   : > { %v3872_v33 = vpop.eup %3871 }
 0x591   : > { %1748 = vrot.lane.b32.xlu0 %v3872_v33, %s4079_s14 }
 0x594   : > { %v3874_v37 = vpop.eup %3873 }
 0x595   : > { %1754 = vrot.lane.b32.xlu1 %v3874_v37, %s4079_s14 }
 0x596   : > { %v3876_v38 = vpop.eup %3875 }
 0x597   : > { %1752 = vrot.lane.b32.xlu0 %v3876_v38, %s4079_s14 }
 0x5e1   : > { %v1727_v40 = vpop.permute.xlu1 %1726 }
 0x5e2   : > { %v1773_v41 = vmul.f32 %v4595_v5, %v1727_v40 }
 0x5e3   : > { %v1725_v44 = vpop.permute.xlu0 %1724 }
 0x5e4   : > { %v1772_v46 = vmul.f32 %v4598_v7, %v1725_v44  ;;  %1815 = vrot.lane.b32.xlu1 %v1773_v41, %s4080_s25 }
 0x5e6   : > { %v1731_v49 = vpop.permute.xlu1 %1730  ;;  %1813 = vrot.lane.b32.xlu0 %v1772_v46, %s4080_s25 }
 0x5e7   : > { %v1775_v50 = vmul.f32 %v4601_v12, %v1731_v49  ;;  %v1729_v51 = vpop.permute.xlu0 %1728 }
 0x5e8   : > { %v1774_v52 = vmul.f32 %v4603_v14, %v1729_v51 }
 0x5e9   : > { %1819 = vrot.lane.b32.xlu1 %v1775_v50, %s4080_s25 }
 0x5ea   : > { %v1735_v53 = vpop.permute.xlu1 %1734  ;;  %1817 = vrot.lane.b32.xlu0 %v1774_v52, %s4080_s25 }
 0x5eb   : > { %v1777_v5 = vmul.f32 %v4607_v23, %v1735_v53 }
 0x5ec   : > { %v1733_v55 = vpop.permute.xlu0 %1732 }
 0x5ed   : > { %v1776_v7 = vmul.f32 %v4609_v28, %v1733_v55  ;;  %1823 = vrot.lane.b32.xlu1 %v1777_v5, %s4080_s25 }
 0x5ee   : > { %v1739_v56 = vpop.permute.xlu1 %1738 }
 0x5ef   : > { %v1779_v58 = vmul.f32 %v4612_v30, %v1739_v56  ;;  %1821 = vrot.lane.b32.xlu0 %v1776_v7, %s4080_s25 }
 0x5f0   : > { %v1737_v12 = vpop.permute.xlu0 %1736 }
 0x5f1   : > { %v1778_v14 = vmul.f32 %v4615_v36, %v1737_v12  ;;  %1827 = vrot.lane.b32.xlu1 %v1779_v58, %s4080_s25 }
 0x5f2   : > { %v1743_v59 = vpop.permute.xlu1 %1742 }
 0x5f3   : > { %v1781_v60 = vmul.f32 %v4618_v47, %v1743_v59  ;;  %1825 = vrot.lane.b32.xlu0 %v1778_v14, %s4080_s25 }
 0x5f5   : > { %1831 = vrot.lane.b32.xlu1 %v1781_v60, %s4080_s25 }
 0x5f8   : > { %v1741_v23 = vpop.permute.xlu0 %1740 }
 0x5f9   : > { %v1780_v28 = vmul.f32 %v4625_v61, %v1741_v23 }
 0x5fa   : > { %v1747_v62 = vpop.permute.xlu1 %1746 }
 0x5fb   : > { %v1783_v30 = vmul.f32 %v4628_v25, %v1747_v62  ;;  %1829 = vrot.lane.b32.xlu0 %v1780_v28, %s4080_s25 }
 0x5fc   : > { %v1745_v16 = vpop.permute.xlu0 %1744 }
 0x5fd   : > { %v1782_v36 = vmul.f32 %v4631_v31, %v1745_v16  ;;  %1835 = vrot.lane.b32.xlu1 %v1783_v30, %s4080_s25 }
 0x5ff   : > { %1833 = vrot.lane.b32.xlu0 %v1782_v36, %s4080_s25 }
 0x600   : > { %v1751_v47 = vpop.permute.xlu1 %1750 }
 0x601   : > { %v1785_v63 = vmul.f32 %v4638_v48, %v1751_v47 }
 0x603   : > { %v1749_v27 = vpop.permute.xlu0 %1748  ;;  %1839 = vrot.lane.b32.xlu1 %v1785_v63, %s4080_s25 }
 0x604   : > { %v1784_v0 = vmul.f32 %v4643_v4, %v1749_v27 }
 0x606   : > { %1837 = vrot.lane.b32.xlu0 %v1784_v0, %s4080_s25 }
 0x607   : > { %v1755_v61 = vpop.permute.xlu1 %1754 }
 0x608   : > { %v1787_v25 = vmul.f32 %v4646_v57, %v1755_v61 }
 0x609   : > { %v1753_v1 = vpop.permute.xlu0 %1752 }
 0x60a   : > { %v1786_v31 = vmul.f32 %v4648_v13, %v1753_v1  ;;  %1843 = vrot.lane.b32.xlu1 %v1787_v25, %s4080_s25 }
 0x60c   : > { %1841 = vrot.lane.b32.xlu0 %v1786_v31, %s4080_s25 }
 0x656   : > { %v1816_v34 = vpop.permute.xlu1 %1815 }
 0x658   : > { %v1814_v2 = vpop.permute.xlu0 %1813 }
 0x659   : > { %3522 = vmatprep.mubr.msk.f32.mxu0 %vm446_vm0, %v1814_v2 }
 0x65a   : > { %3523 = vmatmul.mubr.msk.f32.vlgmr.msra.gmra.mxu0 %vm446_vm0, %v1816_v34 }
 0x65b   : > { %v1820_v39 = vpop.permute.xlu1 %1819 }
 0x65c   : > { %v1818_v45 = vpop.permute.xlu0 %1817 }
 0x65d   : > { %3525 = vmatprep.mubr.msk.f32.mxu0 %vm446_vm0, %v1818_v45 }
 0x65e   : > { %3526 = vmatmul.mubr.msk.f32.gmra.mxu0 %vm446_vm0, %v1820_v39 }
 0x65f   : > { %v1824_v3 = vpop.permute.xlu1 %1823 }
 0x661   : > { %v1822_v48 = vpop.permute.xlu0 %1821 }
 0x662   : > { %3528 = vmatprep.mubr.msk.f32.mxu0 %vm446_vm0, %v1822_v48  ;;  %v4806_v48 = vld [vmem:[%s5230_s6] sm:$0x3] }
 0x663   : > { %3529 = vmatmul.mubr.msk.f32.gmra.mxu0 %vm446_vm0, %v1824_v3  ;;  %v1828_v54 = vpop.permute.xlu1 %1827 }
 0x665   : > { %v1826_v6 = vpop.permute.xlu0 %1825 }
 0x666   : > { %3531 = vmatprep.mubr.msk.f32.mxu0 %vm446_vm0, %v1826_v6 }
 0x667   : > { %3532 = vmatmul.mubr.msk.f32.gmra.mxu0 %vm446_vm0, %v1828_v54  ;;  %v1832_v8 = vpop.permute.xlu1 %1831  ;;  %v2298_v54 = vrot.slane %v4806_v48, %v815_v43 }
 0x66d   : > { %v1830_v4 = vpop.permute.xlu0 %1829 }
 0x66e   : > { %3534 = vmatprep.mubr.msk.f32.mxu0 %vm446_vm0, %v1830_v4 }
 0x66f   : > { %3535 = vmatmul.mubr.msk.f32.gmra.mxu0 %vm446_vm0, %v1832_v8  ;;  %v1836_v10 = vpop.permute.xlu1 %1835 }
 0x671   : > { %v1834_v11 = vpop.permute.xlu0 %1833 }
 0x672   : > { %3537 = vmatprep.mubr.msk.f32.mxu0 %vm446_vm0, %v1834_v11 }
 0x673   : > { %3538 = vmatmul.mubr.msk.f32.gmra.mxu0 %vm446_vm0, %v1836_v10 }
 0x675   : > { %v1840_v9 = vpop.permute.xlu1 %1839 }
 0x678   : > { %v1838_v57 = vpop.permute.xlu0 %1837 }
 0x679   : > { %3540 = vmatprep.mubr.msk.f32.mxu0 %vm446_vm0, %v1838_v57 }
 0x67a   : > { %3541 = vmatmul.mubr.msk.f32.gmra.mxu0 %vm446_vm0, %v1840_v9 }
 0x67c   : > { %v1844_v15 = vpop.permute.xlu1 %1843 }
 0x67e   : > { %v1842_v13 = vpop.permute.xlu0 %1841 }
 0x67f   : > { %3543 = vmatprep.mubr.msk.f32.mxu0 %vm446_vm0, %v1842_v13 }
 0x680   : > { %3544 = vmatmul.mubr.msk.f32.gmra.mxu0 %vm446_vm0, %v1844_v15 }
 0x71a   : > { %v3524_v20 = vpop.f32.mrf.mxu0 }
 0x71b   : > { %v4726_v21 = vadd.f32 %v3524_v20, %v4723_v19 }
 0x71c   : > { %v1943_v26 = vpop.f32.mrf.mxu0 }
 0x71d   : > { %3877 = vtanh.f32 %v4726_v21  ;;  %v4730_v22 = vadd.f32 %v1943_v26, %v4723_v19  ;;  %v2023_v8 = vsub.f32 0.0, %v4726_v21 }
 0x71e   : > { %v3527_v29 = vpop.f32.mrf.mxu0 }
 0x71f   : > { %3879 = vtanh.f32 %v4730_v22  ;;  %v4734_v32 = vadd.f32 %v3527_v29, %v4723_v19  ;;  %v2022_v4 = vsub.f32 0.0, %v4730_v22  ;;  %v2040_v11 = vmul.f32 1.442695, %v2023_v8 }
 0x720   : > { %v1953_v33 = vpop.f32.mrf.mxu0 }
 0x721   : > { %3881 = vtanh.f32 %v4734_v32  ;;  %v4738_v35 = vadd.f32 %v1953_v33, %v4723_v19  ;;  %v2038_v10 = vmul.f32 1.442695, %v2022_v4  ;;  %v2025_v9 = vsub.f32 0.0, %v4734_v32 }
 0x723   : > { %3883 = vtanh.f32 %v4738_v35  ;;  %v3530_v37 = vpop.f32.mrf.mxu0  ;;  %v2024_v57 = vsub.f32 0.0, %v4738_v35  ;;  %v2044_v43 = vmul.f32 1.442695, %v2025_v9 }
 0x724   : > { %v4742_v38 = vadd.f32 %v3530_v37, %v4723_v19 }
 0x725   : > { %v1963_v40 = vpop.f32.mrf.mxu0  ;;  %v2042_v15 = vmul.f32 1.442695, %v2024_v57 }
 0x726   : > { %3885 = vtanh.f32 %v4742_v38  ;;  %v4746_v41 = vadd.f32 %v1963_v40, %v4723_v19  ;;  %v2027_v13 = vsub.f32 0.0, %v4742_v38 }
 0x727   : > { %v3533_v44 = vpop.f32.mrf.mxu0 }
 0x728   : > { %3887 = vtanh.f32 %v4746_v41  ;;  %v4750_v46 = vadd.f32 %v3533_v44, %v4723_v19  ;;  %v2026_v17 = vsub.f32 0.0, %v4746_v41 }
 0x729   : > { %v1973_v50 = vpop.f32.mrf.mxu0 }
 0x72a   : > { %v3878_v49 = vpop.eup %3877  ;;  %v4753_v51 = vadd.f32 %v1973_v50, %v4723_v19  ;;  %3889 = vtanh.f32 %v4750_v46  ;;  %v2029_v18 = vsub.f32 0.0, %v4750_v46  ;;  %v2046_v21 = vmul.f32 1.442695, %v2026_v17 }
 0x72b   : > { %2136 = vrot.lane.b32.xlu1 %v3878_v49, %s4078_s13 }
 0x72c   : > { %v3880_v52 = vpop.eup %3879  ;;  %3891 = vtanh.f32 %v4753_v51  ;;  %v2028_v20 = vsub.f32 0.0, %v4753_v51  ;;  %v2052_v26 = vmul.f32 1.442695, %v2029_v18 }
 0x72d   : > { %2134 = vrot.lane.b32.xlu0 %v3880_v52, %s4078_s13 }
 0x72e   : > { %v3882_v53 = vpop.eup %3881  ;;  %v2050_v22 = vmul.f32 1.442695, %v2028_v20 }
 0x72f   : > { %v3536_v5 = vpop.f32.mrf.mxu0  ;;  %2140 = vrot.lane.b32.xlu1 %v3882_v53, %s4078_s13 }
 0x730   : > { %v3884_v55 = vpop.eup %3883  ;;  %v4761_v7 = vadd.f32 %v3536_v5, %v4723_v19 }
 0x731   : > { %v1983_v56 = vpop.f32.mrf.mxu0  ;;  %2138 = vrot.lane.b32.xlu0 %v3884_v55, %s4078_s13 }
 0x732   : > { %v4765_v58 = vadd.f32 %v1983_v56, %v4723_v19  ;;  %3893 = vtanh.f32 %v4761_v7  ;;  %v2031_v32 = vsub.f32 0.0, %v4761_v7 }
 0x733   : > { %v3886_v12 = vpop.eup %3885  ;;  %v3539_v14 = vpop.f32.mrf.mxu0 }
 0x734   : > { %3895 = vtanh.f32 %v4765_v58  ;;  %2144 = vrot.lane.b32.xlu1 %v3886_v12, %s4078_s13  ;;  %v4771_v60 = vadd.f32 %v3539_v14, %v4723_v19  ;;  %v2056_v37 = vmul.f32 1.442695, %v2031_v32  ;;  %v2030_v38 = vsub.f32 0.0, %v4765_v58 }
 0x735   : > { %v3888_v59 = vpop.eup %3887  ;;  %v1993_v23 = vpop.f32.mrf.mxu0 }
 0x736   : > { %2142 = vrot.lane.b32.xlu0 %v3888_v59, %s4078_s13  ;;  %3897 = vtanh.f32 %v4771_v60  ;;  %v4777_v30 = vadd.f32 %v1993_v23, %v4723_v19  ;;  %v2054_v44 = vmul.f32 1.442695, %v2030_v38  ;;  %v2033_v49 = vsub.f32 0.0, %v4771_v60 }
 0x737   : > { %v3890_v28 = vpop.eup %3889 }
 0x738   : > { %2148 = vrot.lane.b32.xlu1 %v3890_v28, %s4078_s13  ;;  %3899 = vtanh.f32 %v4777_v30  ;;  %v2032_v5 = vsub.f32 0.0, %v4777_v30  ;;  %v2060_v55 = vmul.f32 1.442695, %v2033_v49 }
 0x739   : > { %v3892_v62 = vpop.eup %3891 }
 0x73a   : > { %v3542_v16 = vpop.f32.mrf.mxu0  ;;  %2146 = vrot.lane.b32.xlu0 %v3892_v62, %s4078_s13  ;;  %v2058_v59 = vmul.f32 1.442695, %v2032_v5 }
 0x73b   : > { %v4781_v36 = vadd.f32 %v3542_v16, %v4723_v19 }
 0x73c   : > { %v2003_v47 = vpop.f32.mrf.mxu0 }
 0x73d   : > { %v4785_v63 = vadd.f32 %v2003_v47, %v4723_v19  ;;  %3901 = vtanh.f32 %v4781_v36  ;;  %v2035_v14 = vsub.f32 0.0, %v4781_v36 }
 0x73f   : > { %v3894_v27 = vpop.eup %3893  ;;  %3903 = vtanh.f32 %v4785_v63  ;;  %v2034_v60 = vsub.f32 0.0, %v4785_v63  ;;  %v2064_v62 = vmul.f32 1.442695, %v2035_v14 }
 0x740   : > { %v3545_v61 = vpop.f32.mrf.mxu0  ;;  %2152 = vrot.lane.b32.xlu1 %v3894_v27, %s4078_s13 }
 0x741   : > { %v3896_v0 = vpop.eup %3895  ;;  %v4790_v25 = vadd.f32 %v3545_v61, %v4723_v19  ;;  %v2062_v47 = vmul.f32 1.442695, %v2034_v60 }
 0x742   : > { %2150 = vrot.lane.b32.xlu0 %v3896_v0, %s4078_s13  ;;  %v2013_v1 = vpop.f32.mrf.mxu0 }
 0x743   : > { %v4795_v31 = vadd.f32 %v2013_v1, %v4723_v19  ;;  %3905 = vtanh.f32 %v4790_v25  ;;  %v3898_v34 = vpop.eup %3897  ;;  %v2048_v19 = vmul.f32 1.442695, %v2027_v13  ;;  %v2037_v27 = vsub.f32 0.0, %v4790_v25 }
 0x744   : > { %2156 = vrot.lane.b32.xlu1 %v3898_v34, %s4078_s13 }
 0x745   : > { %3907 = vtanh.f32 %v4795_v31  ;;  %v3900_v2 = vpop.eup %3899  ;;  %v2036_v36 = vsub.f32 0.0, %v4795_v31 }
 0x746   : > { %2154 = vrot.lane.b32.xlu0 %v3900_v2, %s4078_s13  ;;  %3909 = vpow2.f32 %v2040_v11 }
 0x747   : > { %3911 = vpow2.f32 %v2038_v10 }
 0x748   : > { %3913 = vpow2.f32 %v2042_v15 }
 0x749   : > { %3915 = vpow2.f32 %v2044_v43 }
 0x74a   : > { %v3902_v39 = vpop.eup %3901  ;;  %3917 = vpow2.f32 %v2048_v19 }
 0x74b   : > { %2160 = vrot.lane.b32.xlu1 %v3902_v39, %s4078_s13  ;;  %3919 = vpow2.f32 %v2046_v21 }
 0x74c   : > { %v3904_v45 = vpop.eup %3903  ;;  %3921 = vpow2.f32 %v2052_v26 }
 0x74d   : > { %2158 = vrot.lane.b32.xlu0 %v3904_v45, %s4078_s13  ;;  %3923 = vpow2.f32 %v2050_v22  ;;  %v2068_v45 = vmul.f32 1.442695, %v2037_v27 }
 0x750   : > { %v3906_v3 = vpop.eup %3905 }
 0x751   : > { %2164 = vrot.lane.b32.xlu1 %v3906_v3, %s4078_s13  ;;  %v2066_v3 = vmul.f32 1.442695, %v2036_v36 }
 0x752   : > { %v3908_v6 = vpop.eup %3907 }
 0x753   : > { %2162 = vrot.lane.b32.xlu0 %v3908_v6, %s4078_s13  ;;  %v3910_v29 = vpop.eup %3909 }
 0x754   : > { %v3912_v33 = vpop.eup %3911  ;;  %v2071_v35 = vadd.f32 1.0, %v3910_v29 }
 0x755   : > { %v2070_v40 = vadd.f32 1.0, %v3912_v33  ;;  %v3914_v41 = vpop.eup %3913 }
 0x756   : > { %3925 = vrcp.f32 %v2071_v35  ;;  %v3916_v46 = vpop.eup %3915  ;;  %v2072_v51 = vadd.f32 1.0, %v3914_v41 }
 0x757   : > { %2300 = vrot.lane.b32.xlu0 %v2298_v54, %s4079_s14  ;;  %3927 = vpow2.f32 %v2056_v37  ;;  %v3918_v50 = vpop.eup %3917  ;;  %v2073_v53 = vadd.f32 1.0, %v3916_v46 }
 0x758   : > { %3929 = vrcp.f32 %v2070_v40  ;;  %v3920_v52 = vpop.eup %3919  ;;  %v2075_v56 = vadd.f32 1.0, %v3918_v50 }
 0x759   : > { %3931 = vpow2.f32 %v2054_v44  ;;  %v3922_v7 = vpop.eup %3921  ;;  %v2074_v12 = vadd.f32 1.0, %v3920_v52  ;;  %v2322_v44 = vrot.slane %v4806_v48, %v1289_v24 }
 0x75a   : > { %v3924_v58 = vpop.eup %3923  ;;  %3933 = vrcp.f32 %v2072_v51  ;;  %v2077_v23 = vadd.f32 1.0, %v3922_v7 }
 0x75b   : > { %3935 = vrcp.f32 %v2073_v53  ;;  %v2076_v28 = vadd.f32 1.0, %v3924_v58 }
 0x75c   : > { %3937 = vpow2.f32 %v2060_v55 }
 0x75d   : > { %3939 = vrcp.f32 %v2075_v56 }
 0x75e   : > { %3941 = vrcp.f32 %v2074_v12 }
 0x75f   : > { %3943 = vpow2.f32 %v2058_v59 }
 0x760   : > { %3945 = vrcp.f32 %v2077_v23 }
 0x761   : > { %3947 = vrcp.f32 %v2076_v28 }
 0x762   : > { %3949 = vpow2.f32 %v2064_v62 }
 0x763   : > { %v4828_v16 = vpop.eup %3925 }
 0x764   : > { %v3928_v30 = vpop.eup %3927 }
 0x765   : > { %v4833_v1 = vpop.eup %3929  ;;  %v2079_v34 = vadd.f32 1.0, %v3928_v30 }
 0x766   : > { %v3932_v39 = vpop.eup %3931 }
 0x767   : > { %v4836_v6 = vpop.eup %3933  ;;  %v2078_v31 = vadd.f32 1.0, %v3932_v39 }
 0x768   : > { %v4838_v8 = vpop.eup %3935 }
 0x769   : > { %v3938_v11 = vpop.eup %3937 }
 0x76a   : > { %v4841_v10 = vpop.eup %3939  ;;  %v2081_v17 = vadd.f32 1.0, %v3938_v11 }
 0x76b   : > { %v4844_v13 = vpop.eup %3941 }
 0x76c   : > { %v3944_v15 = vpop.eup %3943 }
 0x76d   : > { %v4846_v18 = vpop.eup %3945  ;;  %v2080_v33 = vadd.f32 1.0, %v3944_v15 }
 0x76e   : > { %v4849_v20 = vpop.eup %3947 }
 0x76f   : > { %v3950_v26 = vpop.eup %3949 }
 0x770   : > { %v2083_v41 = vadd.f32 1.0, %v3950_v26 }
 0x79d   : > { %v2137_v0 = vpop.permute.xlu1 %2136 }
 0x79e   : > { %v2183_v61 = vmul.f32 %v4828_v16, %v2137_v0 }
 0x79f   : > { %v2135_v63 = vpop.permute.xlu0 %2134 }
 0x7a0   : > { %3951 = vtanh.f32 %v2183_v61  ;;  %v2182_v2 = vmul.f32 %v4833_v1, %v2135_v63 }
 0x7a1   : > { %3953 = vpow2.f32 %v2062_v47  ;;  %v2141_v25 = vpop.permute.xlu1 %2140 }
 0x7a2   : > { %3955 = vtanh.f32 %v2182_v2  ;;  %v2185_v57 = vmul.f32 %v4838_v8, %v2141_v25 }
 0x7a3   : > { %3957 = vrcp.f32 %v2079_v34  ;;  %v2139_v54 = vpop.permute.xlu0 %2138 }
 0x7a4   : > { %3959 = vpow2.f32 %v2068_v45  ;;  %v2184_v4 = vmul.f32 %v4836_v6, %v2139_v54 }
 0x7a5   : > { %3961 = vpow2.f32 %v2066_v3 }
 0x7a6   : > { %3963 = vtanh.f32 %v2184_v4  ;;  %v2145_v9 = vpop.permute.xlu1 %2144 }
 0x7a7   : > { %3965 = vrcp.f32 %v2078_v31  ;;  %v2187_v21 = vmul.f32 %v4841_v10, %v2145_v9 }
 0x7a8   : > { %v2143_v43 = vpop.permute.xlu0 %2142  ;;  %3967 = vtanh.f32 %v2185_v57 }
 0x7a9   : > { %v2186_v19 = vmul.f32 %v4844_v13, %v2143_v43  ;;  %v2361_v43 = vld [vmem:[%s5231_s7 + $0x10] sm:$0xff] }
 0x7aa   : > { %v2149_v22 = vpop.permute.xlu1 %2148 }
 0x7ab   : > { %3969 = vtanh.f32 %v2186_v19  ;;  %v2189_v38 = vmul.f32 %v4846_v18, %v2149_v22  ;;  %v2359_v22 = vld [vmem:[%s5231_s7] sm:$0xff] }
 0x7ac   : > { %3971 = vrcp.f32 %v2081_v17  ;;  %v2147_v35 = vpop.permute.xlu0 %2146  ;;  %v2362_v17 = vld [vmem:[%s5231_s7 + $0x18] sm:$0xff] }
 0x7ad   : > { %v3952_v29 = vpop.eup %3951  ;;  %3973 = vtanh.f32 %v2187_v21  ;;  %v2188_v40 = vmul.f32 %v4849_v20, %v2147_v35  ;;  %3546 = vmatprep.subr.mxu1 %v2362_v17  ;;  %v2360_v21 = vld [vmem:[%s5231_s7 + $0x8] sm:$0xff] }
 0x7ae   : > { %v3954_v32 = vpop.eup %3953  ;;  %2232 = vrot.lane.b32.xlu1 %v3952_v29, %s4079_s14  ;;  %3547 = vmatpush3.msra.mxu1 %v2362_v17 }
 0x7af   : > { %v3956_v37 = vpop.eup %3955  ;;  %3975 = vtanh.f32 %v2188_v40  ;;  %v2082_v50 = vadd.f32 1.0, %v3954_v32  ;;  %3548 = vmatprep.subr.mxu1 %v2361_v43 }
 0x7b0   : > { %2230 = vrot.lane.b32.xlu0 %v3956_v37, %s4079_s14  ;;  %v4859_v46 = vpop.eup %3957  ;;  %3977 = vrcp.f32 %v2080_v33  ;;  %3549 = vmatpush3.msra.mxu1 %v2361_v43 }
 0x7b1   : > { %v3960_v49 = vpop.eup %3959  ;;  %3979 = vtanh.f32 %v2189_v38  ;;  %3550 = vmatprep.subr.mxu1 %v2360_v21 }
 0x7b2   : > { %v3962_v51 = vpop.eup %3961  ;;  %3981 = vrcp.f32 %v2083_v41  ;;  %v2153_v53 = vpop.permute.xlu1 %2152  ;;  %v2085_v55 = vadd.f32 1.0, %v3960_v49  ;;  %3551 = vmatpush3.msra.mxu1 %v2360_v21 }
 0x7b3   : > { %v3964_v52 = vpop.eup %3963  ;;  %v2191_v42 = vmul.f32 %v4859_v46, %v2153_v53  ;;  %3983 = vrcp.f32 %v2082_v50  ;;  %v2084_v48 = vadd.f32 1.0, %v3962_v51  ;;  %3552 = vmatprep.subr.mxu1 %v2359_v22 }
 0x7b4   : > { %2324 = vrot.lane.b32.xlu0 %v2322_v44, %s4079_s14  ;;  %v4862_v5 = vpop.eup %3965  ;;  %v2151_v7 = vpop.permute.xlu0 %2150  ;;  %2234 = vrot.lane.b32.xlu1 %v3964_v52, %s4079_s14 }
 0x7b5   : > { %v2190_v24 = vmul.f32 %v4862_v5, %v2151_v7  ;;  %3985 = vtanh.f32 %v2191_v42  ;;  %v3968_v56 = vpop.eup %3967  ;;  %3553 = vmatpush3.msra.mxu1 %v2359_v22 }
 0x7b6   : > { %v2157_v14 = vpop.permute.xlu1 %2156 }
 0x7b7   : > { %3987 = vtanh.f32 %v2190_v24 }
 0x7b8   : > { %v3970_v58 = vpop.eup %3969  ;;  %3989 = vrcp.f32 %v2085_v55  ;;  %2236 = vrot.lane.b32.xlu1 %v3968_v56, %s4079_s14  ;;  %v2155_v30 = vpop.permute.xlu0 %2154 }
 0x7b9   : > { %v4868_v12 = vpop.eup %3971  ;;  %2238 = vrot.lane.b32.xlu0 %v3970_v58, %s4079_s14  ;;  %3991 = vrcp.f32 %v2084_v48 }
 0x7ba   : > { %v2193_v59 = vmul.f32 %v4868_v12, %v2157_v14  ;;  %v3974_v23 = vpop.eup %3973 }
 0x7bc   : > { %3993 = vtanh.f32 %v2193_v59  ;;  %2240 = vrot.lane.b32.xlu1 %v3974_v23, %s4079_s14  ;;  %v3976_v60 = vpop.eup %3975 }
 0x7bd   : > { %v4873_v28 = vpop.eup %3977  ;;  %2242 = vrot.lane.b32.xlu0 %v3976_v60, %s4079_s14  ;;  %v2161_v0 = vpop.permute.xlu1 %2160 }
 0x7be   : > { %v3980_v62 = vpop.eup %3979  ;;  %v2192_v27 = vmul.f32 %v4873_v28, %v2155_v30 }
 0x7bf   : > { %v4876_v47 = vpop.eup %3981  ;;  %v2159_v34 = vpop.permute.xlu0 %2158 }
 0x7c0   : > { %2244 = vrot.lane.b32.xlu1 %v3980_v62, %s4079_s14  ;;  %v2195_v36 = vmul.f32 %v4876_v47, %v2161_v0  ;;  %v4881_v61 = vpop.eup %3983  ;;  %3995 = vtanh.f32 %v2192_v27 }
 0x7c1   : > { %v2194_v39 = vmul.f32 %v4881_v61, %v2159_v34 }
 0x7c2   : > { %v3986_v63 = vpop.eup %3985  ;;  %3997 = vtanh.f32 %v2195_v36 }
 0x7c3   : > { %v2165_v3 = vpop.permute.xlu1 %2164  ;;  %3999 = vtanh.f32 %v2194_v39 }
 0x7c4   : > { %v3988_v2 = vpop.eup %3987  ;;  %2248 = vrot.lane.b32.xlu1 %v3986_v63, %s4079_s14 }
 0x7c5   : > { %v4885_v45 = vpop.eup %3989  ;;  %2246 = vrot.lane.b32.xlu0 %v3988_v2, %s4079_s14  ;;  %v2163_v54 = vpop.permute.xlu0 %2162 }
 0x7c6   : > { %v2197_v25 = vmul.f32 %v4885_v45, %v2165_v3  ;;  %v4889_v31 = vpop.eup %3991 }
 0x7c7   : > { %v2196_v4 = vmul.f32 %v4889_v31, %v2163_v54 }
 0x7c8   : > { %4001 = vtanh.f32 %v2197_v25 }
 0x7c9   : > { %v3994_v11 = vpop.eup %3993  ;;  %4003 = vtanh.f32 %v2196_v4  ;;  %v4910_v29 = vpop.permute.xlu0 %2300 }
 0x7ca   : > { %2252 = vrot.lane.b32.xlu1 %v3994_v11, %s4079_s14 }
 0x7cd   : > { %v3996_v57 = vpop.eup %3995 }
 0x7ce   : > { %2250 = vrot.lane.b32.xlu0 %v3996_v57, %s4079_s14 }
 0x7cf   : > { %v3998_v9 = vpop.eup %3997 }
 0x7d0   : > { %2256 = vrot.lane.b32.xlu1 %v3998_v9, %s4079_s14  ;;  %v4000_v15 = vpop.eup %3999 }
 0x7d2   : > { %2254 = vrot.lane.b32.xlu0 %v4000_v15, %s4079_s14 }
 0x7d5   : > { %v4002_v19 = vpop.eup %4001 }
 0x7d6   : > { %2260 = vrot.lane.b32.xlu1 %v4002_v19, %s4079_s14  ;;  %v4004_v26 = vpop.eup %4003 }
 0x7d7   : > { %2258 = vrot.lane.b32.xlu0 %v4004_v26, %s4079_s14 }
 0x820   : > { %v2233_v32 = vpop.permute.xlu1 %2232 }
 0x821   : > { %v2279_v33 = vmul.f32 %v4828_v16, %v2233_v32 }
 0x822   : > { %v2231_v35 = vpop.permute.xlu0 %2230 }
 0x823   : > { %v2278_v37 = vmul.f32 %v4833_v1, %v2231_v35  ;;  %v2304_v38 = vmul.f32 %v4910_v29, %v2279_v33 }
 0x825   : > { %v2303_v40 = vmul.f32 %v4910_v29, %v2278_v37 }
 0x826   : > { %v4916_v41 = vpop.permute.xlu0 %2324  ;;  %v2235_v44 = vpop.permute.xlu1 %2234 }
 0x827   : > { %v2328_v49 = vadd.f32 %v4916_v41, %v2304_v38  ;;  %v2327_v50 = vadd.f32 %v4916_v41, %v2303_v40  ;;  %v2280_v51 = vmul.f32 %v4836_v6, %v2235_v44 }
 0x829   : > { %v2344_v52 = vmax.f32 %v2328_v49, 0.0  ;;  %v2343_v53 = vmax.f32 %v2327_v50, 0.0  ;;  %v2305_v16 = vmul.f32 %v4910_v29, %v2280_v51  ;;  %v2612_v49 = vld [vmem:[%s5233_s9 + $0x8] sm:$0xff] }
 0x82a   : > { %v2237_v55 = vpop.permute.xlu1 %2236  ;;  %3578 = vmatprep.subr.mxu0 %v2612_v49  ;;  %3606 = vmatprep.subr.mxu1 %v2612_v49 }
 0x82b   : > { %2388 = vrot.lane.b32.xlu1 %v2344_v52, %s4080_s25  ;;  %2386 = vrot.lane.b32.xlu0 %v2343_v53, %s4080_s25  ;;  %v2281_v1 = vmul.f32 %v4838_v8, %v2237_v55  ;;  %v2239_v42 = vpop.permute.xlu0 %2238  ;;  %v2329_v7 = vadd.f32 %v4916_v41, %v2305_v16 }
 0x82c   : > { %v2282_v24 = vmul.f32 %v4844_v13, %v2239_v42  ;;  %3579 = vmatpush3.msra.mxu0 %v2612_v49 }
 0x82d   : > { %v2306_v48 = vmul.f32 %v4910_v29, %v2281_v1  ;;  %v2345_v56 = vmax.f32 %v2329_v7, 0.0 }
 0x82e   : > { %v2307_v6 = vmul.f32 %v4910_v29, %v2282_v24  ;;  %v2241_v58 = vpop.permute.xlu1 %2240 }
 0x82f   : > { %v2330_v14 = vadd.f32 %v4916_v41, %v2306_v48  ;;  %v2283_v59 = vmul.f32 %v4841_v10, %v2241_v58  ;;  %2390 = vrot.lane.b32.xlu0 %v2345_v56, %s4080_s25  ;;  %v2243_v8 = vpop.permute.xlu0 %2242 }
 0x830   : > { %v2331_v23 = vadd.f32 %v4916_v41, %v2307_v6  ;;  %v2284_v13 = vmul.f32 %v4849_v20, %v2243_v8 }
 0x831   : > { %v2346_v60 = vmax.f32 %v2330_v14, 0.0  ;;  %v2308_v62 = vmul.f32 %v4910_v29, %v2283_v59 }
 0x832   : > { %v2347_v30 = vmax.f32 %v2331_v23, 0.0  ;;  %v2245_v27 = vpop.permute.xlu1 %2244  ;;  %v2309_v36 = vmul.f32 %v4910_v29, %v2284_v13 }
 0x833   : > { %v2332_v0 = vadd.f32 %v4916_v41, %v2308_v62  ;;  %v2285_v63 = vmul.f32 %v4846_v18, %v2245_v27  ;;  %2392 = vrot.lane.b32.xlu1 %v2346_v60, %s4080_s25 }
 0x834   : > { %2394 = vrot.lane.b32.xlu0 %v2347_v30, %s4080_s25  ;;  %v2333_v34 = vadd.f32 %v4916_v41, %v2309_v36 }
 0x835   : > { %v2348_v10 = vmax.f32 %v2332_v0, 0.0  ;;  %v2310_v2 = vmul.f32 %v4910_v29, %v2285_v63 }
 0x836   : > { %v2249_v39 = vpop.permute.xlu1 %2248  ;;  %v2349_v3 = vmax.f32 %v2333_v34, 0.0 }
 0x837   : > { %v2334_v20 = vadd.f32 %v4916_v41, %v2310_v2  ;;  %v2247_v25 = vpop.permute.xlu0 %2246  ;;  %v2287_v54 = vmul.f32 %v4859_v46, %v2249_v39  ;;  %2396 = vrot.lane.b32.xlu1 %v2348_v10, %s4080_s25  ;;  %v3175_v10 = vld [vmem:[%s5232_s8] ss:$0 sm:$0xff] }
 0x838   : > { %v2286_v18 = vmul.f32 %v4862_v5, %v2247_v25  ;;  %2398 = vrot.lane.b32.xlu0 %v2349_v3, %s4080_s25 }
 0x839   : > { %v2350_v4 = vmax.f32 %v2334_v20, 0.0  ;;  %v2312_v11 = vmul.f32 %v4910_v29, %v2287_v54 }
 0x83a   : > { %v2311_v57 = vmul.f32 %v4910_v29, %v2286_v18 }
 0x83b   : > { %v2336_v9 = vadd.f32 %v4916_v41, %v2312_v11  ;;  %2400 = vrot.lane.b32.xlu1 %v2350_v4, %s4080_s25 }
 0x83c   : > { %v2335_v15 = vadd.f32 %v4916_v41, %v2311_v57  ;;  %v2253_v17 = vpop.permute.xlu1 %2252 }
 0x83d   : > { %v2352_v43 = vmax.f32 %v2336_v9, 0.0  ;;  %v2289_v46 = vmul.f32 %v4868_v12, %v2253_v17 }
 0x83e   : > { %v2351_v19 = vmax.f32 %v2335_v15, 0.0 }
 0x83f   : > { %v2314_v5 = vmul.f32 %v4910_v29, %v2289_v46  ;;  %2404 = vrot.lane.b32.xlu1 %v2352_v43, %s4080_s25 }
 0x840   : > { %2402 = vrot.lane.b32.xlu0 %v2351_v19, %s4080_s25  ;;  %v2251_v26 = vpop.permute.xlu0 %2250 }
 0x841   : > { %v2338_v21 = vadd.f32 %v4916_v41, %v2314_v5  ;;  %v2288_v22 = vmul.f32 %v4873_v28, %v2251_v26  ;;  %v2611_v28 = vld [vmem:[%s5233_s9] sm:$0xff] }
 0x842   : > { %v2257_v33 = vpop.permute.xlu1 %2256  ;;  %3580 = vmatprep.subr.mxu0 %v2611_v28 }
 0x843   : > { %v2354_v32 = vmax.f32 %v2338_v21, 0.0  ;;  %v2291_v35 = vmul.f32 %v4876_v47, %v2257_v33  ;;  %v2313_v37 = vmul.f32 %v4910_v29, %v2288_v22  ;;  %3581 = vmatpush3.msra.mxu0 %v2611_v28 }
 0x844   : > { %v2255_v12 = vpop.permute.xlu0 %2254 }
 0x845   : > { %2408 = vrot.lane.b32.xlu1 %v2354_v32, %s4080_s25  ;;  %v2316_v38 = vmul.f32 %v4910_v29, %v2291_v35  ;;  %v2337_v40 = vadd.f32 %v4916_v41, %v2313_v37  ;;  %v2290_v44 = vmul.f32 %v4881_v61, %v2255_v12 }
 0x847   : > { %v2340_v47 = vadd.f32 %v4916_v41, %v2316_v38  ;;  %v2353_v51 = vmax.f32 %v2337_v40, 0.0  ;;  %v2315_v52 = vmul.f32 %v4910_v29, %v2290_v44 }
 0x848   : > { %v2261_v50 = vpop.permute.xlu1 %2260 }
 0x849   : > { %v2293_v53 = vmul.f32 %v4885_v45, %v2261_v50  ;;  %v2356_v61 = vmax.f32 %v2340_v47, 0.0  ;;  %v2259_v16 = vpop.permute.xlu0 %2258  ;;  %v2339_v55 = vadd.f32 %v4916_v41, %v2315_v52  ;;  %2406 = vrot.lane.b32.xlu0 %v2353_v51, %s4080_s25 }
 0x84a   : > { %v2292_v1 = vmul.f32 %v4889_v31, %v2259_v16 }
 0x84b   : > { %v2318_v42 = vmul.f32 %v4910_v29, %v2293_v53  ;;  %2412 = vrot.lane.b32.xlu1 %v2356_v61, %s4080_s25  ;;  %v2355_v7 = vmax.f32 %v2339_v55, 0.0 }
 0x84c   : > { %v2317_v24 = vmul.f32 %v4910_v29, %v2292_v1 }
 0x84d   : > { %v2342_v45 = vadd.f32 %v4916_v41, %v2318_v42  ;;  %2410 = vrot.lane.b32.xlu0 %v2355_v7, %s4080_s25 }
 0x84e   : > { %v2341_v48 = vadd.f32 %v4916_v41, %v2317_v24 }
 0x84f   : > { %v2358_v56 = vmax.f32 %v2342_v45, 0.0 }
 0x850   : > { %v2357_v6 = vmax.f32 %v2341_v48, 0.0 }
 0x851   : > { %2416 = vrot.lane.b32.xlu1 %v2358_v56, %s4080_s25 }
 0x852   : > { %2414 = vrot.lane.b32.xlu0 %v2357_v6, %s4080_s25 }
 0x89d   : > { %v2389_v31 = vpop.permute.xlu1 %2388  ;;  %v2387_v58 = vpop.permute.xlu0 %2386 }
 0x89e   : > { %3554 = vmatprep.mubr.msk.f32.mxu1 %vm446_vm0, %v2387_v58  ;;  %v3192_v58 = vld [vmem:[%s5234_s10] ss:$0 sm:$0xff] }
 0x89f   : > { %3555 = vmatmul.mubr.msk.f32.vlgmr.msra.gmra.mxu1 %vm446_vm0, %v2389_v31 }
 0x8a0   : > { %3608 = vmatpush3.msra.mxu1 %v2612_v49 }
 0x8a1   : > { %3607 = vmatprep.subr.mxu1 %v2611_v28  ;;  %v2391_v29 = vpop.permute.xlu0 %2390 }
 0x8a2   : > { %3609 = vmatpush3.msra.mxu1 %v2611_v28  ;;  %3557 = vmatprep.mubr.msk.f32.mxu1 %vm446_vm0, %v2391_v29 }
 0x8a5   : > { %v2393_v41 = vpop.permute.xlu1 %2392 }
 0x8a6   : > { %v2395_v14 = vpop.permute.xlu0 %2394  ;;  %3558 = vmatmul.mubr.msk.f32.gmra.mxu1 %vm446_vm0, %v2393_v41 }
 0x8a7   : > { %3560 = vmatprep.mubr.msk.f32.mxu1 %vm446_vm0, %v2395_v14 }
 0x8a9   : > { %v2397_v59 = vpop.permute.xlu1 %2396 }
 0x8aa   : > { %3561 = vmatmul.mubr.msk.f32.gmra.mxu1 %vm446_vm0, %v2397_v59  ;;  %v2399_v23 = vpop.permute.xlu0 %2398 }
 0x8ab   : > { %3563 = vmatprep.mubr.msk.f32.mxu1 %vm446_vm0, %v2399_v23 }
 0x8ad   : > { %v2401_v8 = vpop.permute.xlu1 %2400 }
 0x8ae   : > { %3564 = vmatmul.mubr.msk.f32.gmra.mxu1 %vm446_vm0, %v2401_v8 }
 0x8b1   : > { %v2405_v60 = vpop.permute.xlu1 %2404 }
 0x8b2   : > { %v2403_v62 = vpop.permute.xlu0 %2402 }
 0x8b3   : > { %3566 = vmatprep.mubr.msk.f32.mxu1 %vm446_vm0, %v2403_v62 }
 0x8b4   : > { %3567 = vmatmul.mubr.msk.f32.gmra.mxu1 %vm446_vm0, %v2405_v60 }
 0x8b7   : > { %v2409_v13 = vpop.permute.xlu1 %2408 }
 0x8bb   : > { %v2407_v30 = vpop.permute.xlu0 %2406 }
 0x8bc   : > { %3569 = vmatprep.mubr.msk.f32.mxu1 %vm446_vm0, %v2407_v30 }
 0x8bd   : > { %v2413_v27 = vpop.permute.xlu1 %2412  ;;  %3570 = vmatmul.mubr.msk.f32.gmra.mxu1 %vm446_vm0, %v2409_v13 }
 0x8bf   : > { %v2411_v0 = vpop.permute.xlu0 %2410 }
 0x8c0   : > { %3572 = vmatprep.mubr.msk.f32.mxu1 %vm446_vm0, %v2411_v0 }
 0x8c1   : > { %3573 = vmatmul.mubr.msk.f32.gmra.mxu1 %vm446_vm0, %v2413_v27 }
 0x8c3   : > { %v2417_v36 = vpop.permute.xlu1 %2416 }
 0x8c4   : > { %v2415_v63 = vpop.permute.xlu0 %2414 }
 0x8c5   : > { %3575 = vmatprep.mubr.msk.f32.mxu1 %vm446_vm0, %v2415_v63 }
 0x8c6   : > { %3576 = vmatmul.mubr.msk.f32.gmra.mxu1 %vm446_vm0, %v2417_v36 }
 0x95f   : > { %v3556_v34 = vpop.f32.mrf.mxu1 }
 0x960   : > { %v2522_v2 = vadd.f32 %v3556_v34, %v3175_v10 }
 0x961   : > { %v2516_v39 = vpop.f32.mrf.mxu1 }
 0x962   : > { %v2517_v3 = vadd.f32 %v3175_v10, %v2516_v39  ;;  %v2596_v25 = vmax.f32 %v2522_v2, 0.0 }
 0x964   : > { %v2595_v20 = vmax.f32 %v2517_v3, 0.0 }
 0x966   : > { %3582 = vmatprep.mubr.msk.f32.mxu0 %vm2620_vm1, %v2595_v20  ;;  %v3559_v54 = vpop.f32.mrf.mxu1 }
 0x967   : > { %3583 = vmatmul.mubr.msk.f32.vlgmr.msra.gmra.mxu0 %vm2620_vm1, %v2596_v25  ;;  %v2532_v18 = vadd.f32 %v3559_v54, %v3175_v10 }
 0x968   : > { %v2526_v4 = vpop.f32.mrf.mxu1 }
 0x969   : > { %v2527_v11 = vadd.f32 %v3175_v10, %v2526_v4  ;;  %v2598_v15 = vmax.f32 %v2532_v18, 0.0 }
 0x96a   : > { %v3562_v57 = vpop.f32.mrf.mxu1 }
 0x96b   : > { %v2597_v9 = vmax.f32 %v2527_v11, 0.0  ;;  %v2542_v17 = vadd.f32 %v3562_v57, %v3175_v10 }
 0x96c   : > { %v2536_v43 = vpop.f32.mrf.mxu1 }
 0x96d   : > { %v2537_v46 = vadd.f32 %v3175_v10, %v2536_v43  ;;  %3585 = vmatprep.mubr.msk.f32.mxu0 %vm2620_vm1, %v2597_v9  ;;  %v2600_v21 = vmax.f32 %v2542_v17, 0.0 }
 0x96e   : > { %v3565_v19 = vpop.f32.mrf.mxu1  ;;  %3586 = vmatmul.mubr.msk.f32.gmra.mxu0 %vm2620_vm1, %v2598_v15 }
 0x96f   : > { %v2599_v5 = vmax.f32 %v2537_v46, 0.0  ;;  %v2552_v26 = vadd.f32 %v3565_v19, %v3175_v10 }
 0x970   : > { %v2546_v22 = vpop.f32.mrf.mxu1 }
 0x971   : > { %v2547_v32 = vadd.f32 %v3175_v10, %v2546_v22  ;;  %3588 = vmatprep.mubr.msk.f32.mxu0 %vm2620_vm1, %v2599_v5  ;;  %v2602_v35 = vmax.f32 %v2552_v26, 0.0 }
 0x972   : > { %3589 = vmatmul.mubr.msk.f32.gmra.mxu0 %vm2620_vm1, %v2600_v21 }
 0x973   : > { %v2601_v33 = vmax.f32 %v2547_v32, 0.0 }
 0x974   : > { %v3568_v37 = vpop.f32.mrf.mxu1 }
 0x975   : > { %3591 = vmatprep.mubr.msk.f32.mxu0 %vm2620_vm1, %v2601_v33  ;;  %v2562_v12 = vadd.f32 %v3568_v37, %v3175_v10 }
 0x976   : > { %v2556_v38 = vpop.f32.mrf.mxu1  ;;  %3592 = vmatmul.mubr.msk.f32.gmra.mxu0 %vm2620_vm1, %v2602_v35 }
 0x977   : > { %v2557_v40 = vadd.f32 %v3175_v10, %v2556_v38  ;;  %v2604_v49 = vmax.f32 %v2562_v12, 0.0 }
 0x979   : > { %v2603_v44 = vmax.f32 %v2557_v40, 0.0 }
 0x97b   : > { %3594 = vmatprep.mubr.msk.f32.mxu0 %vm2620_vm1, %v2603_v44 }
 0x97c   : > { %3595 = vmatmul.mubr.msk.f32.gmra.mxu0 %vm2620_vm1, %v2604_v49 }
 0x97d   : > { %v3571_v28 = vpop.f32.mrf.mxu1 }
 0x97e   : > { %v2572_v47 = vadd.f32 %v3571_v28, %v3175_v10 }
 0x97f   : > { %v2566_v50 = vpop.f32.mrf.mxu1 }
 0x980   : > { %v2567_v51 = vadd.f32 %v3175_v10, %v2566_v50  ;;  %v2606_v61 = vmax.f32 %v2572_v47, 0.0 }
 0x981   : > { %v3574_v52 = vpop.f32.mrf.mxu1 }
 0x982   : > { %v2605_v53 = vmax.f32 %v2567_v51, 0.0  ;;  %v2582_v16 = vadd.f32 %v3574_v52, %v3175_v10 }
 0x983   : > { %v2576_v55 = vpop.f32.mrf.mxu1 }
 0x984   : > { %v2577_v1 = vadd.f32 %v3175_v10, %v2576_v55  ;;  %3597 = vmatprep.mubr.msk.f32.mxu0 %vm2620_vm1, %v2605_v53  ;;  %v2608_v24 = vmax.f32 %v2582_v16, 0.0 }
 0x985   : > { %3598 = vmatmul.mubr.msk.f32.gmra.mxu0 %vm2620_vm1, %v2606_v61 }
 0x986   : > { %v3577_v42 = vpop.f32.mrf.mxu1  ;;  %v2607_v7 = vmax.f32 %v2577_v1, 0.0 }
 0x987   : > { %v2592_v45 = vadd.f32 %v3577_v42, %v3175_v10 }
 0x988   : > { %v2586_v48 = vpop.f32.mrf.mxu1  ;;  %3600 = vmatprep.mubr.msk.f32.mxu0 %vm2620_vm1, %v2607_v7 }
 0x989   : > { %v2587_v56 = vadd.f32 %v3175_v10, %v2586_v48  ;;  %3601 = vmatmul.mubr.msk.f32.gmra.mxu0 %vm2620_vm1, %v2608_v24  ;;  %v2610_v31 = vmax.f32 %v2592_v45, 0.0 }
 0x98b   : > { %v2609_v6 = vmax.f32 %v2587_v56, 0.0 }
 0x98d   : > { %3603 = vmatprep.mubr.msk.f32.mxu1 %vm2620_vm1, %v2609_v6 }
 0x98e   : > { %3604 = vmatmul.mubr.msk.f32.vlgmr.msra.gmra.mxu1 %vm2620_vm1, %v2610_v31 }
 0xa27   : > { %v3584_v29 = vpop.f32.mrf.mxu0 }
 0xa28   : > { %v5022_v41 = vadd.f32 %v3584_v29, %v3192_v58 }
 0xa29   : > { %v2735_v14 = vpop.f32.mrf.mxu0 }
 0xa2a   : > { %v5024_v59 = vadd.f32 %v3192_v58, %v2735_v14  ;;  %v2818_v23 = vsel %vm2814_vm2, %v5022_v41, -inf }
 0xa2b   : > { %2819 = vmax.xlane.f32.xlu1 %v2818_v23 }
 0xa2c   : > { %v2815_v8 = vsel %vm2814_vm2, %v5024_v59, -inf }
 0xa2d   : > { %2816 = vmax.xlane.f32.xlu0 %v2815_v8 }
 0xa2e   : > { %v3587_v60 = vpop.f32.mrf.mxu0 }
 0xa2f   : > { %v5030_v62 = vadd.f32 %v3587_v60, %v3192_v58 }
 0xa30   : > { %v2745_v13 = vpop.f32.mrf.mxu0 }
 0xa31   : > { %v5032_v30 = vadd.f32 %v3192_v58, %v2745_v13  ;;  %v2824_v27 = vsel %vm2814_vm2, %v5030_v62, -inf }
 0xa32   : > { %2825 = vmax.xlane.f32.xlu0 %v2824_v27  ;;  %v3590_v0 = vpop.f32.mrf.mxu0 }
 0xa33   : > { %v5036_v63 = vadd.f32 %v3590_v0, %v3192_v58  ;;  %v2821_v34 = vsel %vm2814_vm2, %v5032_v30, -inf }
 0xa34   : > { %v2755_v36 = vpop.f32.mrf.mxu0 }
 0xa35   : > { %v5038_v10 = vadd.f32 %v3192_v58, %v2755_v36  ;;  %v2830_v54 = vsel %vm2814_vm2, %v5036_v63, -inf }
 0xa36   : > { %2822 = vmax.xlane.f32.xlu0 %v2821_v34  ;;  %v3593_v2 = vpop.f32.mrf.mxu0 }
 0xa37   : > { %v2827_v39 = vsel %vm2814_vm2, %v5038_v10, -inf  ;;  %v5044_v20 = vadd.f32 %v3593_v2, %v3192_v58 }
 0xa38   : > { %2828 = vmax.xlane.f32.xlu1 %v2827_v39  ;;  %v2765_v3 = vpop.f32.mrf.mxu0 }
 0xa39   : > { %v5046_v25 = vadd.f32 %v3192_v58, %v2765_v3  ;;  %v2836_v57 = vsel %vm2814_vm2, %v5044_v20, -inf }
 0xa3a   : > { %2831 = vmax.xlane.f32.xlu0 %v2830_v54 }
 0xa3b   : > { %v2833_v18 = vsel %vm2814_vm2, %v5046_v25, -inf }
 0xa3c   : > { %v3596_v4 = vpop.f32.mrf.mxu0  ;;  %2834 = vmax.xlane.f32.xlu1 %v2833_v18 }
 0xa3d   : > { %v5052_v11 = vadd.f32 %v3596_v4, %v3192_v58 }
 0xa3e   : > { %v2775_v9 = vpop.f32.mrf.mxu0  ;;  %2837 = vmax.xlane.f32.xlu0 %v2836_v57 }
 0xa3f   : > { %v5056_v15 = vadd.f32 %v3192_v58, %v2775_v9  ;;  %v2842_v43 = vsel %vm2814_vm2, %v5052_v11, -inf }
 0xa41   : > { %v2839_v17 = vsel %vm2814_vm2, %v5056_v15, -inf }
 0xa42   : > { %2840 = vmax.xlane.f32.xlu1 %v2839_v17  ;;  %2843 = vmax.xlane.f32.xlu0 %v2842_v43 }
 0xa45   : > { %v3599_v46 = vpop.f32.mrf.mxu0 }
 0xa46   : > { %v5062_v19 = vadd.f32 %v3599_v46, %v3192_v58 }
 0xa47   : > { %v2785_v5 = vpop.f32.mrf.mxu0 }
 0xa48   : > { %v5064_v21 = vadd.f32 %v3192_v58, %v2785_v5  ;;  %v2848_v26 = vsel %vm2814_vm2, %v5062_v19, -inf }
 0xa49   : > { %v3602_v22 = vpop.f32.mrf.mxu0  ;;  %2849 = vmax.xlane.f32.xlu0 %v2848_v26 }
 0xa4a   : > { %v5068_v32 = vadd.f32 %v3602_v22, %v3192_v58  ;;  %v2845_v33 = vsel %vm2814_vm2, %v5064_v21, -inf }
 0xa4b   : > { %2846 = vmax.xlane.f32.xlu1 %v2845_v33  ;;  %v2795_v35 = vpop.f32.mrf.mxu0 }
 0xa4c   : > { %v5072_v37 = vadd.f32 %v3192_v58, %v2795_v35  ;;  %v2854_v12 = vsel %vm2814_vm2, %v5068_v32, -inf }
 0xa4d   : > { %2855 = vmax.xlane.f32.xlu0 %v2854_v12 }
 0xa4e   : > { %v3605_v38 = vpop.f32.mrf.mxu1  ;;  %v2851_v44 = vsel %vm2814_vm2, %v5072_v37, -inf }
 0xa4f   : > { %v5076_v40 = vadd.f32 %v3605_v38, %v3192_v58  ;;  %2852 = vmax.xlane.f32.xlu1 %v2851_v44 }
 0xa50   : > { %v2805_v49 = vpop.f32.mrf.mxu1 }
 0xa51   : > { %v5080_v28 = vadd.f32 %v3192_v58, %v2805_v49  ;;  %v2860_v47 = vsel %vm2814_vm2, %v5076_v40, -inf }
 0xa52   : > { %2861 = vmax.xlane.f32.xlu0 %v2860_v47 }
 0xa53   : > { %v2857_v50 = vsel %vm2814_vm2, %v5080_v28, -inf }
 0xa54   : > { %2858 = vmax.xlane.f32.xlu1 %v2857_v50 }
 0xab4   : > { %v2820_v51 = vpop.xlane.xlu1 %2819 }
 0xab5   : > { %v5087_v52 = vsub.f32 %v5022_v41, %v2820_v51 }
 0xab6   : > { %v2817_v53 = vpop.xlane.xlu0 %2816 }
 0xab7   : > { %v2881_v61 = vmul.f32 1.442695, %v5087_v52  ;;  %v5091_v16 = vsub.f32 %v5024_v59, %v2817_v53 }
 0xab9   : > { %4005 = vpow2.f32 %v2881_v61  ;;  %v2879_v55 = vmul.f32 1.442695, %v5091_v16 }
 0xabb   : > { %4007 = vpow2.f32 %v2879_v55  ;;  %v2826_v1 = vpop.xlane.xlu0 %2825 }
 0xabc   : > { %v5095_v42 = vsub.f32 %v5030_v62, %v2826_v1 }
 0xabe   : > { %v2885_v7 = vmul.f32 1.442695, %v5095_v42 }
 0xabf   : > { %v2823_v24 = vpop.xlane.xlu0 %2822 }
 0xac0   : > { %4009 = vpow2.f32 %v2885_v7  ;;  %v5099_v45 = vsub.f32 %v5032_v30, %v2823_v24 }
 0xac1   : > { %v2829_v48 = vpop.xlane.xlu1 %2828 }
 0xac2   : > { %v2883_v56 = vmul.f32 1.442695, %v5099_v45  ;;  %v5103_v6 = vsub.f32 %v5038_v10, %v2829_v48 }
 0xac3   : > { %v2832_v31 = vpop.xlane.xlu0 %2831 }
 0xac4   : > { %4011 = vpow2.f32 %v2883_v56  ;;  %v2887_v58 = vmul.f32 1.442695, %v5103_v6  ;;  %v5107_v29 = vsub.f32 %v5036_v63, %v2832_v31 }
 0xac5   : > { %v2835_v14 = vpop.xlane.xlu1 %2834 }
 0xac6   : > { %v4006_v41 = vpop.eup %4005  ;;  %4013 = vpow2.f32 %v2887_v58  ;;  %v2889_v59 = vmul.f32 1.442695, %v5107_v29  ;;  %v5111_v23 = vsub.f32 %v5046_v25, %v2835_v14 }
 0xac7   : > { %v2914_v8 = vsel %vm2814_vm2, %v4006_v41, 0.0  ;;  %v2838_v62 = vpop.xlane.xlu0 %2837 }
 0xac8   : > { %v4008_v60 = vpop.eup %4007  ;;  %2915 = vadd.xlane.f32.xlu0 %v2914_v8  ;;  %4015 = vpow2.f32 %v2889_v59  ;;  %v2891_v13 = vmul.f32 1.442695, %v5111_v23  ;;  %v5116_v30 = vsub.f32 %v5044_v20, %v2838_v62 }
 0xac9   : > { %v2911_v27 = vsel %vm2814_vm2, %v4008_v60, 0.0 }
 0xaca   : > { %2912 = vadd.xlane.f32.xlu1 %v2911_v27  ;;  %4017 = vpow2.f32 %v2891_v13  ;;  %v2893_v0 = vmul.f32 1.442695, %v5116_v30 }
 0xacb   : > { %v2841_v36 = vpop.xlane.xlu1 %2840  ;;  %v2844_v63 = vpop.xlane.xlu0 %2843 }
 0xacc   : > { %4019 = vpow2.f32 %v2893_v0  ;;  %v5121_v10 = vsub.f32 %v5056_v15, %v2841_v36  ;;  %v5124_v34 = vsub.f32 %v5052_v11, %v2844_v63 }
 0xacd   : > { %v4010_v2 = vpop.eup %4009 }
 0xace   : > { %v2895_v39 = vmul.f32 1.442695, %v5121_v10  ;;  %v2897_v3 = vmul.f32 1.442695, %v5124_v34  ;;  %v2920_v20 = vsel %vm2814_vm2, %v4010_v2, 0.0 }
 0xacf   : > { %2921 = vadd.xlane.f32.xlu0 %v2920_v20 }
 0xad0   : > { %4021 = vpow2.f32 %v2895_v39 }
 0xad1   : > { %v4012_v25 = vpop.eup %4011  ;;  %4023 = vpow2.f32 %v2897_v3 }
 0xad2   : > { %v2917_v54 = vsel %vm2814_vm2, %v4012_v25, 0.0  ;;  %v2850_v4 = vpop.xlane.xlu0 %2849 }
 0xad3   : > { %v4014_v18 = vpop.eup %4013  ;;  %2918 = vadd.xlane.f32.xlu1 %v2917_v54  ;;  %v5131_v11 = vsub.f32 %v5062_v19, %v2850_v4 }
 0xad4   : > { %v2847_v9 = vpop.xlane.xlu1 %2846  ;;  %v2923_v15 = vsel %vm2814_vm2, %v4014_v18, 0.0 }
 0xad5   : > { %v4016_v57 = vpop.eup %4015  ;;  %v5136_v46 = vsub.f32 %v5064_v21, %v2847_v9  ;;  %v2901_v5 = vmul.f32 1.442695, %v5131_v11 }
 0xad6   : > { %v2926_v17 = vsel %vm2814_vm2, %v4016_v57, 0.0  ;;  %v2856_v26 = vpop.xlane.xlu0 %2855 }
 0xad7   : > { %v4018_v43 = vpop.eup %4017  ;;  %2924 = vadd.xlane.f32.xlu1 %v2923_v15  ;;  %2927 = vadd.xlane.f32.xlu0 %v2926_v17  ;;  %v2899_v33 = vmul.f32 1.442695, %v5136_v46  ;;  %4025 = vpow2.f32 %v2901_v5  ;;  %v5141_v19 = vsub.f32 %v5068_v32, %v2856_v26 }
 0xad8   : > { %v2853_v35 = vpop.xlane.xlu1 %2852  ;;  %v2929_v12 = vsel %vm2814_vm2, %v4018_v43, 0.0 }
 0xad9   : > { %v4020_v22 = vpop.eup %4019  ;;  %4027 = vpow2.f32 %v2899_v33  ;;  %v5146_v21 = vsub.f32 %v5072_v37, %v2853_v35  ;;  %v2905_v44 = vmul.f32 1.442695, %v5141_v19 }
 0xada   : > { %v2932_v38 = vsel %vm2814_vm2, %v4020_v22, 0.0 }
 0xadb   : > { %2930 = vadd.xlane.f32.xlu1 %v2929_v12  ;;  %2933 = vadd.xlane.f32.xlu0 %v2932_v38  ;;  %v2862_v49 = vpop.xlane.xlu0 %2861  ;;  %v2903_v50 = vmul.f32 1.442695, %v5146_v21  ;;  %4029 = vpow2.f32 %v2905_v44 }
 0xadc   : > { %v5151_v32 = vsub.f32 %v5076_v40, %v2862_v49 }
 0xadd   : > { %v4022_v47 = vpop.eup %4021  ;;  %v2859_v53 = vpop.xlane.xlu1 %2858  ;;  %4031 = vpow2.f32 %v2903_v50 }
 0xade   : > { %v4024_v51 = vpop.eup %4023  ;;  %v2935_v61 = vsel %vm2814_vm2, %v4022_v47, 0.0  ;;  %v5155_v37 = vsub.f32 %v5080_v28, %v2859_v53  ;;  %v2909_v55 = vmul.f32 1.442695, %v5151_v32 }
 0xadf   : > { %2936 = vadd.xlane.f32.xlu1 %v2935_v61  ;;  %v2938_v1 = vsel %vm2814_vm2, %v4024_v51, 0.0 }
 0xae0   : > { %2939 = vadd.xlane.f32.xlu0 %v2938_v1  ;;  %v2907_v7 = vmul.f32 1.442695, %v5155_v37  ;;  %4033 = vpow2.f32 %v2909_v55 }
 0xae2   : > { %4035 = vpow2.f32 %v2907_v7 }
 0xae4   : > { %v4026_v40 = vpop.eup %4025 }
 0xae5   : > { %v2944_v24 = vsel %vm2814_vm2, %v4026_v40, 0.0 }
 0xae6   : > { %v4028_v48 = vpop.eup %4027  ;;  %2945 = vadd.xlane.f32.xlu0 %v2944_v24 }
 0xae7   : > { %v2941_v56 = vsel %vm2814_vm2, %v4028_v48, 0.0 }
 0xae8   : > { %v4030_v31 = vpop.eup %4029  ;;  %2942 = vadd.xlane.f32.xlu1 %v2941_v56 }
 0xae9   : > { %v2950_v28 = vsel %vm2814_vm2, %v4030_v31, 0.0 }
 0xaea   : > { %v4032_v58 = vpop.eup %4031  ;;  %2951 = vadd.xlane.f32.xlu0 %v2950_v28 }
 0xaeb   : > { %v2947_v41 = vsel %vm2814_vm2, %v4032_v58, 0.0 }
 0xaec   : > { %2948 = vadd.xlane.f32.xlu1 %v2947_v41 }
 0xaed   : > { %v4034_v14 = vpop.eup %4033 }
 0xaee   : > { %v2956_v59 = vsel %vm2814_vm2, %v4034_v14, 0.0 }
 0xaef   : > { %v4036_v8 = vpop.eup %4035  ;;  %2957 = vadd.xlane.f32.xlu0 %v2956_v59 }
 0xaf0   : > { %v2953_v60 = vsel %vm2814_vm2, %v4036_v8, 0.0 }
 0xaf1   : > { %2954 = vadd.xlane.f32.xlu1 %v2953_v60 }
 0xb51   : > { %v2916_v62 = vpop.xlane.xlu0 %2915 }
 0xb52   : > { %4037 = vlog2.f32 %v2916_v62 }
 0xb53   : > { %v2913_v13 = vpop.xlane.xlu1 %2912 }
 0xb54   : > { %4039 = vlog2.f32 %v2913_v13 }
 0xb58   : > { %v2922_v27 = vpop.xlane.xlu0 %2921 }
 0xb59   : > { %4041 = vlog2.f32 %v2922_v27 }
 0xb5c   : > { %v2919_v0 = vpop.xlane.xlu1 %2918 }
 0xb5d   : > { %4043 = vlog2.f32 %v2919_v0 }
 0xb5f   : > { %v4038_v36 = vpop.eup %4037 }
 0xb60   : > { %v2962_v63 = vmul.f32 0.6931472, %v4038_v36  ;;  %v2925_v39 = vpop.xlane.xlu1 %2924  ;;  %v2928_v3 = vpop.xlane.xlu0 %2927 }
 0xb61   : > { %v4040_v2 = vpop.eup %4039  ;;  %4045 = vlog2.f32 %v2925_v39 }
 0xb62   : > { %v2992_v20 = vsub.f32 %v5087_v52, %v2962_v63  ;;  %v2960_v25 = vmul.f32 0.6931472, %v4040_v2  ;;  %4047 = vlog2.f32 %v2928_v3 }
 0xb64   : > { %3008 = vst.msk [vmem:[%s5171_s26 + $0x8] sm:$0xff] %vm2814_vm2, %v2992_v20  ;;  %v2991_v54 = vsub.f32 %v5091_v16, %v2960_v25  ;;  %v2931_v18 = vpop.xlane.xlu1 %2930  ;;  %v2934_v4 = vpop.xlane.xlu0 %2933 }
 0xb65   : > { %4049 = vlog2.f32 %v2931_v18 }
 0xb66   : > { %3007 = vst.msk [vmem:[%s5171_s26] sm:$0xff] %vm2814_vm2, %v2991_v54  ;;  %v4042_v57 = vpop.eup %4041  ;;  %4051 = vlog2.f32 %v2934_v4 }
 0xb67   : > { %v2966_v9 = vmul.f32 0.6931472, %v4042_v57 }
 0xb68   : > { %v2937_v15 = vpop.xlane.xlu1 %2936 }
 0xb69   : > { %v2994_v52 = vsub.f32 %v5095_v42, %v2966_v9  ;;  %4053 = vlog2.f32 %v2937_v15  ;;  %v2940_v17 = vpop.xlane.xlu0 %2939 }
 0xb6a   : > { %v4044_v43 = vpop.eup %4043  ;;  %4055 = vlog2.f32 %v2940_v17 }
 0xb6b   : > { %3010 = vst.msk [vmem:[%s5171_s26 + $0x18] sm:$0xff] %vm2814_vm2, %v2994_v52  ;;  %v2964_v16 = vmul.f32 0.6931472, %v4044_v43 }
 0xb6d   : > { %v2993_v5 = vsub.f32 %v5099_v45, %v2964_v16 }
 0xb6e   : > { %v4046_v26 = vpop.eup %4045 }
 0xb6f   : > { %v4048_v22 = vpop.eup %4047  ;;  %3009 = vst.msk [vmem:[%s5171_s26 + $0x10] sm:$0xff] %vm2814_vm2, %v2993_v5  ;;  %v2968_v33 = vmul.f32 0.6931472, %v4046_v26  ;;  %v2946_v42 = vpop.xlane.xlu0 %2945 }
 0xb70   : > { %v2970_v35 = vmul.f32 0.6931472, %v4048_v22  ;;  %4057 = vlog2.f32 %v2946_v42 }
 0xb71   : > { %v2995_v12 = vsub.f32 %v5103_v6, %v2968_v33  ;;  %v2943_v45 = vpop.xlane.xlu1 %2942 }
 0xb72   : > { %v4050_v38 = vpop.eup %4049  ;;  %v2996_v44 = vsub.f32 %v5107_v29, %v2970_v35  ;;  %4059 = vlog2.f32 %v2943_v45 }
 0xb73   : > { %v4052_v49 = vpop.eup %4051  ;;  %3011 = vst.msk [vmem:[%s5171_s26 + $0x20] sm:$0xff] %vm2814_vm2, %v2995_v12  ;;  %v2972_v47 = vmul.f32 0.6931472, %v4050_v38  ;;  %v2952_v6 = vpop.xlane.xlu0 %2951 }
 0xb74   : > { %3012 = vst.msk [vmem:[%s5171_s26 + $0x28] sm:$0xff] %vm2814_vm2, %v2996_v44  ;;  %v2974_v50 = vmul.f32 0.6931472, %v4052_v49  ;;  %4061 = vlog2.f32 %v2952_v6 }
 0xb75   : > { %v2997_v51 = vsub.f32 %v5111_v23, %v2972_v47  ;;  %v2949_v1 = vpop.xlane.xlu1 %2948 }
 0xb76   : > { %v4054_v53 = vpop.eup %4053  ;;  %v2998_v61 = vsub.f32 %v5116_v30, %v2974_v50  ;;  %4063 = vlog2.f32 %v2949_v1 }
 0xb77   : > { %v4056_v29 = vpop.eup %4055  ;;  %3013 = vst.msk [vmem:[%s5171_s26 + $0x30] sm:$0xff] %vm2814_vm2, %v2997_v51  ;;  %v2976_v55 = vmul.f32 0.6931472, %v4054_v53 }
 0xb78   : > { %3014 = vst.msk [vmem:[%s5171_s26 + $0x38] sm:$0xff] %vm2814_vm2, %v2998_v61  ;;  %v2978_v7 = vmul.f32 0.6931472, %v4056_v29  ;;  %v2958_v23 = vpop.xlane.xlu0 %2957 }
 0xb79   : > { %v2999_v40 = vsub.f32 %v5121_v10, %v2976_v55  ;;  %4065 = vlog2.f32 %v2958_v23 }
 0xb7a   : > { %v3000_v24 = vsub.f32 %v5124_v34, %v2978_v7  ;;  %v2955_v30 = vpop.xlane.xlu1 %2954 }
 0xb7b   : > { %3015 = vst.msk [vmem:[%s5171_s26 + $0x40] sm:$0xff] %vm2814_vm2, %v2999_v40  ;;  %4067 = vlog2.f32 %v2955_v30 }
 0xb7c   : > { %3016 = vst.msk [vmem:[%s5171_s26 + $0x48] sm:$0xff] %vm2814_vm2, %v3000_v24 }
 0xb7d   : > { %v4058_v48 = vpop.eup %4057 }
 0xb7e   : > { %v2982_v56 = vmul.f32 0.6931472, %v4058_v48 }
 0xb7f   : > { %v4060_v31 = vpop.eup %4059 }
 0xb80   : > { %v2980_v28 = vmul.f32 0.6931472, %v4060_v31  ;;  %v3002_v58 = vsub.f32 %v5131_v11, %v2982_v56 }
 0xb81   : > { %v4062_v10 = vpop.eup %4061 }
 0xb82   : > { %v3001_v41 = vsub.f32 %v5136_v46, %v2980_v28  ;;  %3018 = vst.msk [vmem:[%s5171_s26 + $0x58] sm:$0xff] %vm2814_vm2, %v3002_v58  ;;  %v2986_v34 = vmul.f32 0.6931472, %v4062_v10 }
 0xb83   : > { %v4064_v14 = vpop.eup %4063 }
 0xb84   : > { %3017 = vst.msk [vmem:[%s5171_s26 + $0x50] sm:$0xff] %vm2814_vm2, %v3001_v41  ;;  %v2984_v59 = vmul.f32 0.6931472, %v4064_v14  ;;  %v3004_v8 = vsub.f32 %v5141_v19, %v2986_v34 }
 0xb86   : > { %v4066_v60 = vpop.eup %4065  ;;  %v3003_v62 = vsub.f32 %v5146_v21, %v2984_v59  ;;  %3020 = vst.msk [vmem:[%s5171_s26 + $0x68] sm:$0xff] %vm2814_vm2, %v3004_v8 }
 0xb87   : > { %v2990_v11 = vmul.f32 0.6931472, %v4066_v60 }
 0xb88   : > { %v4068_v13 = vpop.eup %4067  ;;  %3019 = vst.msk [vmem:[%s5171_s26 + $0x60] sm:$0xff] %vm2814_vm2, %v3003_v62 }
 0xb89   : > { %v2988_v46 = vmul.f32 0.6931472, %v4068_v13  ;;  %v3006_v27 = vsub.f32 %v5151_v32, %v2990_v11 }
 0xb8b   : > { %v3005_v0 = vsub.f32 %v5155_v37, %v2988_v46  ;;  %3022 = vst.msk [vmem:[%s5171_s26 + $0x78] sm:$0xff] %vm2814_vm2, %v3006_v27 }
 0xb8d   : > { %3021 = vst.msk [vmem:[%s5171_s26 + $0x70] sm:$0xff] %vm2814_vm2, %v3005_v0 }
 0xb8e PF: > { %s21_s17 = sadd.s32 1, %s4076_s17  }
 0xb8f   : > { %p18_p5 = scmp.ge.s32.totalorder %s21_s17, 6  }
 0xb91   :  { %20 = sbr.rel (!%p18_p5) target bundleno = 1 (0x1), region = 99 }

</bundles_post_ra>
